<compile_context>
chip_gen: v5e
topology: v5e:2x2
jax: 0.10.0
libtpu: 0.0.40
codegen_flags: <defaults>
</compile_context>

<pallas_src>
import functools

import jax
import jax.numpy as jnp
from jax.experimental import pallas as pl
from jax.experimental.pallas import tpu as pltpu


def _round_up(x, m):
    return (x + m - 1) // m * m


# ---------------------------------------------------------------------------
# Kernel: whole net for one batch tile (weights VMEM-resident, blocks unrolled)
# ---------------------------------------------------------------------------
def _fc_net_kernel(x_ref, wz_ref, bz_ref, wmlp_ref, bmlp_ref, out_ref,
                   *, nb, Hp):
    x = x_ref[...]                                              # (TB, Cp)

    def relu(v):
        return jnp.maximum(v, 0.0)

    # FC_block #i = Lin_bidirectional + Affine coupling.  nb is a trace-time
    # constant, so this Python loop is fully unrolled with static indices.
    for i in range(nb):
        # Lin_bidirectional (weights pre-transposed + lane-padded):
        #   z = x @ W.T + b  laid out as [xh | pad | yh | pad]
        z = jnp.dot(x, wz_ref[i], preferred_element_type=jnp.float32) + bz_ref[i]
        xh = z[:, :Hp]                      # lane-aligned slice (no masking)
        yh = z[:, Hp:]

        def lin(j, v):
            return (jnp.dot(v, wmlp_ref[i, j], preferred_element_type=jnp.float32)
                    + bmlp_ref[i, j])

        # Affine.compute_nets: two residual MLP sub-blocks on the first half.
        h = lin(1, relu(lin(0, relu(xh)))) + xh
        h = lin(3, relu(lin(2, relu(h)))) + h
        h = relu(h)

        # mults (ms folded into weights/bias) and adds heads, half width.
        mf = lin(4, h)
        af = lin(5, h)

        # Affine.forward: [xh | yh * exp(m) + a]  (both halves lane-aligned)
        x = jnp.concatenate([xh, yh * jnp.exp(mf) + af], axis=1)

    # Trailing Lin_bidirectional (no affine path).  Full-width unmasked store.
    out_ref[...] = (jnp.dot(x, wz_ref[nb], preferred_element_type=jnp.float32)
                    + bz_ref[nb])


# ---------------------------------------------------------------------------
# Parameter packing: stack per-block params, pre-transpose, lane-pad, fold ms
# ---------------------------------------------------------------------------
def pack_fc_net_params(block_params, final_params):
    C = final_params["w"].shape[0]
    half = C // 2
    Hp = _round_up(half, 128)          # lane-aligned half width
    Cp = 2 * Hp                        # lane-aligned full width
    nb = len(block_params)

    def pad_full_weight(w):
        # torch convention: z = x @ w.T + b.  Return padded transposed weight
        # so the kernel does z = x_pad @ wt_pad + b_pad with layout
        # [x_half | pad | y_half | pad] on both input and output channels.
        wt = w.T                                                   # (in, out)
        out = jnp.zeros((Cp, Cp), jnp.float32)
        out = out.at[:half, :half].set(wt[:half, :half])
        out = out.at[:half, Hp:Hp + half].set(wt[:half, half:])
        out = out.at[Hp:Hp + half, :half].set(wt[half:, :half])
        out = out.at[Hp:Hp + half, Hp:Hp + half].set(wt[half:, half:])
        return out

    def pad_full_bias(b):                                          # (1, C)
        out = jnp.zeros((1, Cp), jnp.float32)
        out = out.at[:, :half].set(b[:, :half])
        out = out.at[:, Hp:Hp + half].set(b[:, half:])
        return out

    wz = jnp.zeros((nb + 1, Cp, Cp), jnp.float32)
    bz = jnp.zeros((nb + 1, 1, Cp), jnp.float32)
    n_mlp = max(nb, 1)
    # wstack order per block: lina, linb, linc, lind, mults, adds
    wmlp = jnp.zeros((n_mlp, 6, Hp, Hp), jnp.float32)
    bmlp = jnp.zeros((n_mlp, 6, 1, Hp), jnp.float32)

    for i, p in enumerate(block_params):
        wz = wz.at[i].set(pad_full_weight(p["linw"]))
        bz = bz.at[i].set(pad_full_bias(p["linb"]))
        ms = p["ms"]                                               # (1, half)
        for j in range(6):
            wt = p["wstack"][j].T                                  # (in, out)
            bt = p["bstack"][j]                                    # (1, half)
            if j == 4:                       # mults head: fold ms scale
                wt = wt * ms
                bt = bt * ms
            wmlp = wmlp.at[i, j, :half, :half].set(wt)
            bmlp = bmlp.at[i, j, :, :half].set(bt)

    # Trailing Lin_bidirectional.
    wz = wz.at[nb].set(pad_full_weight(final_params["w"]))
    bz = bz.at[nb].set(pad_full_bias(final_params["b"]))

    return dict(wz=wz, bz=bz, wmlp=wmlp, bmlp=bmlp,
                half=half, Hp=Hp, Cp=Cp, nb=nb)


# ---------------------------------------------------------------------------
# Wrapper: single pallas_call for the whole net
# ---------------------------------------------------------------------------
def fc_net_forward(x, packed, *, batch_tile=None):
    B, C = x.shape
    half, Hp, Cp, nb = packed["half"], packed["Hp"], packed["Cp"], packed["nb"]
    assert C == 2 * half

    # Lane-pad the input into the [x_half | pad | y_half | pad] layout.
    xp = jnp.zeros((B, Cp), jnp.float32)
    xp = xp.at[:, :half].set(x[:, :half].astype(jnp.float32))
    xp = xp.at[:, Hp:Hp + half].set(x[:, half:].astype(jnp.float32))

    # Batch tile: for production batches prefer multiples of 128/256 (and >=2
    # tiles on v7x so both TensorCores get work); small batches use one tile.
    if batch_tile is None:
        TB = B
        for cand in (512, 256, 128):
            if B % cand == 0:
                TB = cand
                break
    else:
        TB = batch_tile
    assert B % TB == 0
    grid = (B // TB,)

    wz, bz, wmlp, bmlp = packed["wz"], packed["bz"], packed["wmlp"], packed["bmlp"]

    kernel = functools.partial(_fc_net_kernel, nb=nb, Hp=Hp)

    # Weights use full-shape blocks with a constant index_map: DMA'd into VMEM
    # once and reused by every batch tile.  Only the activation tiles move per
    # grid step.
    in_specs = [
        pl.BlockSpec((TB, Cp), lambda b: (b, 0)),                  # x
        pl.BlockSpec(wz.shape, lambda b: (0, 0, 0)),               # wz
        pl.BlockSpec(bz.shape, lambda b: (0, 0, 0)),               # bz
        pl.BlockSpec(wmlp.shape, lambda b: (0, 0, 0, 0)),          # wmlp
        pl.BlockSpec(bmlp.shape, lambda b: (0, 0, 0, 0)),          # bmlp
    ]
    out_spec = pl.BlockSpec((TB, Cp), lambda b: (b, 0))

    # VMEM budget: resident weights (double-buffered by the pipeliner) plus
    # activation tiles.  Only raise the limit when the defaults would be tight
    # (large C) — for production C >= ~1024 consider bf16 weights or falling
    # back to step-streamed weights.
    est_vmem = (2 * sum(int(a.size) * 4 for a in (wz, bz, wmlp, bmlp))
                + 4 * TB * Cp * 4 + (1 << 20))
    cp_kwargs = {}
    if est_vmem > 16 * 1024 * 1024:
        cp_kwargs["vmem_limit_bytes"] = int(est_vmem)

    out = pl.pallas_call(
        kernel,
        out_shape=jax.ShapeDtypeStruct((B, Cp), jnp.float32),
        grid=grid,
        in_specs=in_specs,
        out_specs=out_spec,
        compiler_params=pltpu.CompilerParams(
            dimension_semantics=("parallel",), **cp_kwargs),
    )(xp, wz, bz, wmlp, bmlp)

    # Strip the lane padding back to the original [x_half | y_half] layout.
    return jnp.concatenate([out[:, :half], out[:, Hp:Hp + half]], axis=1)


# ---------------------------------------------------------------------------
# Deterministic parameter init (shapes per the PyTorch __init__)
# ---------------------------------------------------------------------------
def init_params(key, channels, blocks):
    half = channels // 2
    orth = jax.nn.initializers.orthogonal()
    block_params = []
    for _ in range(blocks):
        key, k_lin, k_w, k_b = jax.random.split(key, 4)
        block_params.append({
            # Lin_bidirectional: orthogonal weight, zero bias
            "linw": orth(k_lin, (channels, channels), jnp.float32),
            "linb": jnp.zeros((1, channels), jnp.float32),
            # Affine's 6 Linear(half, half): lina, linb, linc, lind, mults, adds
            "wstack": jax.random.uniform(
                k_w, (6, half, half), jnp.float32, minval=-1.0, maxval=1.0
            ) / jnp.sqrt(half),
            "bstack": jax.random.uniform(
                k_b, (6, 1, half), jnp.float32, minval=-1.0, maxval=1.0
            ) / jnp.sqrt(half),
            # ms is nn.Parameter(zeros) in the module
            "ms": jnp.zeros((1, half), jnp.float32),
        })
    key, k_fin = jax.random.split(key)
    final_params = {
        "w": orth(k_fin, (channels, channels), jnp.float32),
        "b": jnp.zeros((1, channels), jnp.float32),
    }
    return block_params, final_params


# ---------------------------------------------------------------------------
# Pure-JAX reference (mirrors the PyTorch forward exactly)
# ---------------------------------------------------------------------------
def _ref_block(x, p, half):
    z = x @ p["linw"].T + p["linb"]
    xh, yh = z[:, :half], z[:, half:]

    def lin(i, v):
        return v @ p["wstack"][i].T + p["bstack"][i]

    relu = lambda v: jnp.maximum(v, 0.0)
    prex = xh
    h = lin(1, relu(lin(0, relu(xh)))) + prex
    prex = h
    h = lin(3, relu(lin(2, relu(h)))) + prex
    h = relu(h)
    m = lin(4, h) * p["ms"]
    a = lin(5, h)
    return jnp.concatenate([xh, yh * jnp.exp(m) + a], axis=1)


def fc_net_reference(x, block_params, final_params):
    half = x.shape[1] // 2
    for p in block_params:
        x = _ref_block(x, p, half)
    return x @ final_params["w"].T + final_params["b"]


# TODO(synk): the inverse()/logdet paths (torch.inverse, torch.slogdet) of the
# module are not implemented; only the forward pass is kernelized.

# ---------------------------------------------------------------------------
if __name__ == "__main__":
    hparams = {"channels": 32, "batch_size": 8, "blocks": 2}

    key = jax.random.PRNGKey(0)
    key, k_data, k_params = jax.random.split(key, 3)

    # make_normal_batch: standard multivariate normal samples, shape (B, channels)
    x = jax.random.normal(k_data, (hparams["batch_size"], hparams["channels"]),
                          dtype=jnp.float32)

    block_params, final_params = init_params(k_params, hparams["channels"],
                                             hparams["blocks"])
    packed = pack_fc_net_params(block_params, final_params)

    out = fc_net_forward(x, packed)
    out = jax.block_until_ready(out)

    ref = fc_net_reference(x, block_params, final_params)
    assert out.shape == (hparams["batch_size"], hparams["channels"])
    assert jnp.allclose(out, ref, atol=1e-4, rtol=1e-4), \
        "mismatch vs pure-JAX reference"

    print("KERNEL_OK")
</pallas_src>

<mosaic_0001>
module attributes {stable_mosaic.version = 11 : i64} {
  func.func @_fc_net_kernel(%arg0: i32, %arg1: memref<8x256xf32, #tpu.memory_space<vmem>>, %arg2: memref<3x256x256xf32, #tpu.memory_space<vmem>>, %arg3: memref<3x1x256xf32, #tpu.memory_space<vmem>>, %arg4: memref<2x6x128x128xf32, #tpu.memory_space<vmem>>, %arg5: memref<2x6x1x128xf32, #tpu.memory_space<vmem>>, %arg6: memref<8x256xf32, #tpu.memory_space<vmem>>) attributes {dimension_semantics = [#tpu.dimension_semantics<parallel>], iteration_bounds = array<i64: 1>, scalar_prefetch = 0 : i64, scratch_operands = 0 : i64, tpu.core_type = #tpu.core_type<tc>, window_params = [{transform_indices = @transform_0, window_bounds = array<i64: 8, 256>}, {pipeline_mode = #tpu.pipeline_mode<synchronous>, transform_indices = @transform_1, window_bounds = array<i64: 3, 256, 256>}, {pipeline_mode = #tpu.pipeline_mode<synchronous>, transform_indices = @transform_2, window_bounds = array<i64: 3, 1, 256>}, {pipeline_mode = #tpu.pipeline_mode<synchronous>, transform_indices = @transform_3, window_bounds = array<i64: 2, 6, 128, 128>}, {pipeline_mode = #tpu.pipeline_mode<synchronous>, transform_indices = @transform_4, window_bounds = array<i64: 2, 6, 1, 128>}, {transform_indices = @transform_5, window_bounds = array<i64: 8, 256>}]} {
    %c0 = arith.constant 0 : index
    %c0_0 = arith.constant 0 : index
    %0 = vector.load %arg1[%c0, %c0_0] : memref<8x256xf32, #tpu.memory_space<vmem>>, vector<8x256xf32>
    %c0_1 = arith.constant 0 : index
    %c0_2 = arith.constant 0 : index
    %c0_3 = arith.constant 0 : index
    %1 = vector.load %arg2[%c0_1, %c0_2, %c0_3] : memref<3x256x256xf32, #tpu.memory_space<vmem>>, vector<1x256x256xf32>
    %2 = vector.shape_cast %1 : vector<1x256x256xf32> to vector<256x256xf32>
    %cst = arith.constant dense<0.000000e+00> : vector<8x256xf32>
    %3 = tpu.matmul %0, %2, %cst {dimension_numbers = #tpu.dot_dimension_numbers<[1], [0], [0], [1], [0, 0, 1, 1], [], []>} : vector<8x256xf32>, vector<256x256xf32>, vector<8x256xf32> -> vector<8x256xf32>
    %c0_4 = arith.constant 0 : index
    %c0_5 = arith.constant 0 : index
    %c0_6 = arith.constant 0 : index
    %4 = vector.load %arg3[%c0_4, %c0_5, %c0_6] : memref<3x1x256xf32, #tpu.memory_space<vmem>>, vector<1x1x256xf32>
    %5 = vector.shape_cast %4 : vector<1x1x256xf32> to vector<1x256xf32>
    %6 = vector.broadcast %5 : vector<1x256xf32> to vector<8x256xf32>
    %7 = arith.addf %3, %6 : vector<8x256xf32>
    %8 = vector.extract_strided_slice %7 {offsets = [0, 0], sizes = [8, 128], strides = [1, 1]} : vector<8x256xf32> to vector<8x128xf32>
    %9 = vector.extract_strided_slice %7 {offsets = [0, 128], sizes = [8, 128], strides = [1, 1]} : vector<8x256xf32> to vector<8x128xf32>
    %cst_7 = arith.constant 0.000000e+00 : f32
    %10 = vector.broadcast %cst_7 : f32 to vector<8x128xf32>
    %11 = arith.maximumf %8, %10 : vector<8x128xf32>
    %c0_8 = arith.constant 0 : index
    %c0_9 = arith.constant 0 : index
    %c0_10 = arith.constant 0 : index
    %c0_11 = arith.constant 0 : index
    %12 = vector.load %arg4[%c0_8, %c0_9, %c0_10, %c0_11] : memref<2x6x128x128xf32, #tpu.memory_space<vmem>>, vector<1x1x128x128xf32>
    %13 = vector.shape_cast %12 : vector<1x1x128x128xf32> to vector<128x128xf32>
    %cst_12 = arith.constant dense<0.000000e+00> : vector<8x128xf32>
    %14 = tpu.matmul %11, %13, %cst_12 {dimension_numbers = #tpu.dot_dimension_numbers<[1], [0], [0], [1], [0, 0, 1, 1], [], []>} : vector<8x128xf32>, vector<128x128xf32>, vector<8x128xf32> -> vector<8x128xf32>
    %c0_13 = arith.constant 0 : index
    %c0_14 = arith.constant 0 : index
    %c0_15 = arith.constant 0 : index
    %c0_16 = arith.constant 0 : index
    %15 = vector.load %arg5[%c0_13, %c0_14, %c0_15, %c0_16] : memref<2x6x1x128xf32, #tpu.memory_space<vmem>>, vector<1x1x1x128xf32>
    %16 = vector.shape_cast %15 : vector<1x1x1x128xf32> to vector<1x128xf32>
    %17 = vector.broadcast %16 : vector<1x128xf32> to vector<8x128xf32>
    %18 = arith.addf %14, %17 : vector<8x128xf32>
    %cst_17 = arith.constant 0.000000e+00 : f32
    %19 = vector.broadcast %cst_17 : f32 to vector<8x128xf32>
    %20 = arith.maximumf %18, %19 : vector<8x128xf32>
    %c0_18 = arith.constant 0 : index
    %c1 = arith.constant 1 : index
    %c0_19 = arith.constant 0 : index
    %c0_20 = arith.constant 0 : index
    %21 = vector.load %arg4[%c0_18, %c1, %c0_19, %c0_20] : memref<2x6x128x128xf32, #tpu.memory_space<vmem>>, vector<1x1x128x128xf32>
    %22 = vector.shape_cast %21 : vector<1x1x128x128xf32> to vector<128x128xf32>
    %cst_21 = arith.constant dense<0.000000e+00> : vector<8x128xf32>
    %23 = tpu.matmul %20, %22, %cst_21 {dimension_numbers = #tpu.dot_dimension_numbers<[1], [0], [0], [1], [0, 0, 1, 1], [], []>} : vector<8x128xf32>, vector<128x128xf32>, vector<8x128xf32> -> vector<8x128xf32>
    %c0_22 = arith.constant 0 : index
    %c1_23 = arith.constant 1 : index
    %c0_24 = arith.constant 0 : index
    %c0_25 = arith.constant 0 : index
    %24 = vector.load %arg5[%c0_22, %c1_23, %c0_24, %c0_25] : memref<2x6x1x128xf32, #tpu.memory_space<vmem>>, vector<1x1x1x128xf32>
    %25 = vector.shape_cast %24 : vector<1x1x1x128xf32> to vector<1x128xf32>
    %26 = vector.broadcast %25 : vector<1x128xf32> to vector<8x128xf32>
    %27 = arith.addf %23, %26 : vector<8x128xf32>
    %28 = arith.addf %27, %8 : vector<8x128xf32>
    %cst_26 = arith.constant 0.000000e+00 : f32
    %29 = vector.broadcast %cst_26 : f32 to vector<8x128xf32>
    %30 = arith.maximumf %28, %29 : vector<8x128xf32>
    %c0_27 = arith.constant 0 : index
    %c2 = arith.constant 2 : index
    %c0_28 = arith.constant 0 : index
    %c0_29 = arith.constant 0 : index
    %31 = vector.load %arg4[%c0_27, %c2, %c0_28, %c0_29] : memref<2x6x128x128xf32, #tpu.memory_space<vmem>>, vector<1x1x128x128xf32>
    %32 = vector.shape_cast %31 : vector<1x1x128x128xf32> to vector<128x128xf32>
    %cst_30 = arith.constant dense<0.000000e+00> : vector<8x128xf32>
    %33 = tpu.matmul %30, %32, %cst_30 {dimension_numbers = #tpu.dot_dimension_numbers<[1], [0], [0], [1], [0, 0, 1, 1], [], []>} : vector<8x128xf32>, vector<128x128xf32>, vector<8x128xf32> -> vector<8x128xf32>
    %c0_31 = arith.constant 0 : index
    %c2_32 = arith.constant 2 : index
    %c0_33 = arith.constant 0 : index
    %c0_34 = arith.constant 0 : index
    %34 = vector.load %arg5[%c0_31, %c2_32, %c0_33, %c0_34] : memref<2x6x1x128xf32, #tpu.memory_space<vmem>>, vector<1x1x1x128xf32>
    %35 = vector.shape_cast %34 : vector<1x1x1x128xf32> to vector<1x128xf32>
    %36 = vector.broadcast %35 : vector<1x128xf32> to vector<8x128xf32>
    %37 = arith.addf %33, %36 : vector<8x128xf32>
    %cst_35 = arith.constant 0.000000e+00 : f32
    %38 = vector.broadcast %cst_35 : f32 to vector<8x128xf32>
    %39 = arith.maximumf %37, %38 : vector<8x128xf32>
    %c0_36 = arith.constant 0 : index
    %c3 = arith.constant 3 : index
    %c0_37 = arith.constant 0 : index
    %c0_38 = arith.constant 0 : index
    %40 = vector.load %arg4[%c0_36, %c3, %c0_37, %c0_38] : memref<2x6x128x128xf32, #tpu.memory_space<vmem>>, vector<1x1x128x128xf32>
    %41 = vector.shape_cast %40 : vector<1x1x128x128xf32> to vector<128x128xf32>
    %cst_39 = arith.constant dense<0.000000e+00> : vector<8x128xf32>
    %42 = tpu.matmul %39, %41, %cst_39 {dimension_numbers = #tpu.dot_dimension_numbers<[1], [0], [0], [1], [0, 0, 1, 1], [], []>} : vector<8x128xf32>, vector<128x128xf32>, vector<8x128xf32> -> vector<8x128xf32>
    %c0_40 = arith.constant 0 : index
    %c3_41 = arith.constant 3 : index
    %c0_42 = arith.constant 0 : index
    %c0_43 = arith.constant 0 : index
    %43 = vector.load %arg5[%c0_40, %c3_41, %c0_42, %c0_43] : memref<2x6x1x128xf32, #tpu.memory_space<vmem>>, vector<1x1x1x128xf32>
    %44 = vector.shape_cast %43 : vector<1x1x1x128xf32> to vector<1x128xf32>
    %45 = vector.broadcast %44 : vector<1x128xf32> to vector<8x128xf32>
    %46 = arith.addf %42, %45 : vector<8x128xf32>
    %47 = arith.addf %46, %28 : vector<8x128xf32>
    %cst_44 = arith.constant 0.000000e+00 : f32
    %48 = vector.broadcast %cst_44 : f32 to vector<8x128xf32>
    %49 = arith.maximumf %47, %48 : vector<8x128xf32>
    %c0_45 = arith.constant 0 : index
    %c4 = arith.constant 4 : index
    %c0_46 = arith.constant 0 : index
    %c0_47 = arith.constant 0 : index
    %50 = vector.load %arg4[%c0_45, %c4, %c0_46, %c0_47] : memref<2x6x128x128xf32, #tpu.memory_space<vmem>>, vector<1x1x128x128xf32>
    %51 = vector.shape_cast %50 : vector<1x1x128x128xf32> to vector<128x128xf32>
    %cst_48 = arith.constant dense<0.000000e+00> : vector<8x128xf32>
    %52 = tpu.matmul %49, %51, %cst_48 {dimension_numbers = #tpu.dot_dimension_numbers<[1], [0], [0], [1], [0, 0, 1, 1], [], []>} : vector<8x128xf32>, vector<128x128xf32>, vector<8x128xf32> -> vector<8x128xf32>
    %c0_49 = arith.constant 0 : index
    %c4_50 = arith.constant 4 : index
    %c0_51 = arith.constant 0 : index
    %c0_52 = arith.constant 0 : index
    %53 = vector.load %arg5[%c0_49, %c4_50, %c0_51, %c0_52] : memref<2x6x1x128xf32, #tpu.memory_space<vmem>>, vector<1x1x1x128xf32>
    %54 = vector.shape_cast %53 : vector<1x1x1x128xf32> to vector<1x128xf32>
    %55 = vector.broadcast %54 : vector<1x128xf32> to vector<8x128xf32>
    %56 = arith.addf %52, %55 : vector<8x128xf32>
    %c0_53 = arith.constant 0 : index
    %c5 = arith.constant 5 : index
    %c0_54 = arith.constant 0 : index
    %c0_55 = arith.constant 0 : index
    %57 = vector.load %arg4[%c0_53, %c5, %c0_54, %c0_55] : memref<2x6x128x128xf32, #tpu.memory_space<vmem>>, vector<1x1x128x128xf32>
    %58 = vector.shape_cast %57 : vector<1x1x128x128xf32> to vector<128x128xf32>
    %cst_56 = arith.constant dense<0.000000e+00> : vector<8x128xf32>
    %59 = tpu.matmul %49, %58, %cst_56 {dimension_numbers = #tpu.dot_dimension_numbers<[1], [0], [0], [1], [0, 0, 1, 1], [], []>} : vector<8x128xf32>, vector<128x128xf32>, vector<8x128xf32> -> vector<8x128xf32>
    %c0_57 = arith.constant 0 : index
    %c5_58 = arith.constant 5 : index
    %c0_59 = arith.constant 0 : index
    %c0_60 = arith.constant 0 : index
    %60 = vector.load %arg5[%c0_57, %c5_58, %c0_59, %c0_60] : memref<2x6x1x128xf32, #tpu.memory_space<vmem>>, vector<1x1x1x128xf32>
    %61 = vector.shape_cast %60 : vector<1x1x1x128xf32> to vector<1x128xf32>
    %62 = vector.broadcast %61 : vector<1x128xf32> to vector<8x128xf32>
    %63 = arith.addf %59, %62 : vector<8x128xf32>
    %64 = math.exp %56 : vector<8x128xf32>
    %65 = arith.mulf %9, %64 : vector<8x128xf32>
    %66 = arith.addf %65, %63 : vector<8x128xf32>
    %67 = tpu.concatenate %8, %66 in 1 : vector<8x128xf32>, vector<8x128xf32> -> vector<8x256xf32>
    %c1_61 = arith.constant 1 : index
    %c0_62 = arith.constant 0 : index
    %c0_63 = arith.constant 0 : index
    %68 = vector.load %arg2[%c1_61, %c0_62, %c0_63] : memref<3x256x256xf32, #tpu.memory_space<vmem>>, vector<1x256x256xf32>
    %69 = vector.shape_cast %68 : vector<1x256x256xf32> to vector<256x256xf32>
    %cst_64 = arith.constant dense<0.000000e+00> : vector<8x256xf32>
    %70 = tpu.matmul %67, %69, %cst_64 {dimension_numbers = #tpu.dot_dimension_numbers<[1], [0], [0], [1], [0, 0, 1, 1], [], []>} : vector<8x256xf32>, vector<256x256xf32>, vector<8x256xf32> -> vector<8x256xf32>
    %c1_65 = arith.constant 1 : index
    %c0_66 = arith.constant 0 : index
    %c0_67 = arith.constant 0 : index
    %71 = vector.load %arg3[%c1_65, %c0_66, %c0_67] : memref<3x1x256xf32, #tpu.memory_space<vmem>>, vector<1x1x256xf32>
    %72 = vector.shape_cast %71 : vector<1x1x256xf32> to vector<1x256xf32>
    %73 = vector.broadcast %72 : vector<1x256xf32> to vector<8x256xf32>
    %74 = arith.addf %70, %73 : vector<8x256xf32>
    %75 = vector.extract_strided_slice %74 {offsets = [0, 0], sizes = [8, 128], strides = [1, 1]} : vector<8x256xf32> to vector<8x128xf32>
    %76 = vector.extract_strided_slice %74 {offsets = [0, 128], sizes = [8, 128], strides = [1, 1]} : vector<8x256xf32> to vector<8x128xf32>
    %cst_68 = arith.constant 0.000000e+00 : f32
    %77 = vector.broadcast %cst_68 : f32 to vector<8x128xf32>
    %78 = arith.maximumf %75, %77 : vector<8x128xf32>
    %c1_69 = arith.constant 1 : index
    %c0_70 = arith.constant 0 : index
    %c0_71 = arith.constant 0 : index
    %c0_72 = arith.constant 0 : index
    %79 = vector.load %arg4[%c1_69, %c0_70, %c0_71, %c0_72] : memref<2x6x128x128xf32, #tpu.memory_space<vmem>>, vector<1x1x128x128xf32>
    %80 = vector.shape_cast %79 : vector<1x1x128x128xf32> to vector<128x128xf32>
    %cst_73 = arith.constant dense<0.000000e+00> : vector<8x128xf32>
    %81 = tpu.matmul %78, %80, %cst_73 {dimension_numbers = #tpu.dot_dimension_numbers<[1], [0], [0], [1], [0, 0, 1, 1], [], []>} : vector<8x128xf32>, vector<128x128xf32>, vector<8x128xf32> -> vector<8x128xf32>
    %c1_74 = arith.constant 1 : index
    %c0_75 = arith.constant 0 : index
    %c0_76 = arith.constant 0 : index
    %c0_77 = arith.constant 0 : index
    %82 = vector.load %arg5[%c1_74, %c0_75, %c0_76, %c0_77] : memref<2x6x1x128xf32, #tpu.memory_space<vmem>>, vector<1x1x1x128xf32>
    %83 = vector.shape_cast %82 : vector<1x1x1x128xf32> to vector<1x128xf32>
    %84 = vector.broadcast %83 : vector<1x128xf32> to vector<8x128xf32>
    %85 = arith.addf %81, %84 : vector<8x128xf32>
    %cst_78 = arith.constant 0.000000e+00 : f32
    %86 = vector.broadcast %cst_78 : f32 to vector<8x128xf32>
    %87 = arith.maximumf %85, %86 : vector<8x128xf32>
    %c1_79 = arith.constant 1 : index
    %c1_80 = arith.constant 1 : index
    %c0_81 = arith.constant 0 : index
    %c0_82 = arith.constant 0 : index
    %88 = vector.load %arg4[%c1_79, %c1_80, %c0_81, %c0_82] : memref<2x6x128x128xf32, #tpu.memory_space<vmem>>, vector<1x1x128x128xf32>
    %89 = vector.shape_cast %88 : vector<1x1x128x128xf32> to vector<128x128xf32>
    %cst_83 = arith.constant dense<0.000000e+00> : vector<8x128xf32>
    %90 = tpu.matmul %87, %89, %cst_83 {dimension_numbers = #tpu.dot_dimension_numbers<[1], [0], [0], [1], [0, 0, 1, 1], [], []>} : vector<8x128xf32>, vector<128x128xf32>, vector<8x128xf32> -> vector<8x128xf32>
    %c1_84 = arith.constant 1 : index
    %c1_85 = arith.constant 1 : index
    %c0_86 = arith.constant 0 : index
    %c0_87 = arith.constant 0 : index
    %91 = vector.load %arg5[%c1_84, %c1_85, %c0_86, %c0_87] : memref<2x6x1x128xf32, #tpu.memory_space<vmem>>, vector<1x1x1x128xf32>
    %92 = vector.shape_cast %91 : vector<1x1x1x128xf32> to vector<1x128xf32>
    %93 = vector.broadcast %92 : vector<1x128xf32> to vector<8x128xf32>
    %94 = arith.addf %90, %93 : vector<8x128xf32>
    %95 = arith.addf %94, %75 : vector<8x128xf32>
    %cst_88 = arith.constant 0.000000e+00 : f32
    %96 = vector.broadcast %cst_88 : f32 to vector<8x128xf32>
    %97 = arith.maximumf %95, %96 : vector<8x128xf32>
    %c1_89 = arith.constant 1 : index
    %c2_90 = arith.constant 2 : index
    %c0_91 = arith.constant 0 : index
    %c0_92 = arith.constant 0 : index
    %98 = vector.load %arg4[%c1_89, %c2_90, %c0_91, %c0_92] : memref<2x6x128x128xf32, #tpu.memory_space<vmem>>, vector<1x1x128x128xf32>
    %99 = vector.shape_cast %98 : vector<1x1x128x128xf32> to vector<128x128xf32>
    %cst_93 = arith.constant dense<0.000000e+00> : vector<8x128xf32>
    %100 = tpu.matmul %97, %99, %cst_93 {dimension_numbers = #tpu.dot_dimension_numbers<[1], [0], [0], [1], [0, 0, 1, 1], [], []>} : vector<8x128xf32>, vector<128x128xf32>, vector<8x128xf32> -> vector<8x128xf32>
    %c1_94 = arith.constant 1 : index
    %c2_95 = arith.constant 2 : index
    %c0_96 = arith.constant 0 : index
    %c0_97 = arith.constant 0 : index
    %101 = vector.load %arg5[%c1_94, %c2_95, %c0_96, %c0_97] : memref<2x6x1x128xf32, #tpu.memory_space<vmem>>, vector<1x1x1x128xf32>
    %102 = vector.shape_cast %101 : vector<1x1x1x128xf32> to vector<1x128xf32>
    %103 = vector.broadcast %102 : vector<1x128xf32> to vector<8x128xf32>
    %104 = arith.addf %100, %103 : vector<8x128xf32>
    %cst_98 = arith.constant 0.000000e+00 : f32
    %105 = vector.broadcast %cst_98 : f32 to vector<8x128xf32>
    %106 = arith.maximumf %104, %105 : vector<8x128xf32>
    %c1_99 = arith.constant 1 : index
    %c3_100 = arith.constant 3 : index
    %c0_101 = arith.constant 0 : index
    %c0_102 = arith.constant 0 : index
    %107 = vector.load %arg4[%c1_99, %c3_100, %c0_101, %c0_102] : memref<2x6x128x128xf32, #tpu.memory_space<vmem>>, vector<1x1x128x128xf32>
    %108 = vector.shape_cast %107 : vector<1x1x128x128xf32> to vector<128x128xf32>
    %cst_103 = arith.constant dense<0.000000e+00> : vector<8x128xf32>
    %109 = tpu.matmul %106, %108, %cst_103 {dimension_numbers = #tpu.dot_dimension_numbers<[1], [0], [0], [1], [0, 0, 1, 1], [], []>} : vector<8x128xf32>, vector<128x128xf32>, vector<8x128xf32> -> vector<8x128xf32>
    %c1_104 = arith.constant 1 : index
    %c3_105 = arith.constant 3 : index
    %c0_106 = arith.constant 0 : index
    %c0_107 = arith.constant 0 : index
    %110 = vector.load %arg5[%c1_104, %c3_105, %c0_106, %c0_107] : memref<2x6x1x128xf32, #tpu.memory_space<vmem>>, vector<1x1x1x128xf32>
    %111 = vector.shape_cast %110 : vector<1x1x1x128xf32> to vector<1x128xf32>
    %112 = vector.broadcast %111 : vector<1x128xf32> to vector<8x128xf32>
    %113 = arith.addf %109, %112 : vector<8x128xf32>
    %114 = arith.addf %113, %95 : vector<8x128xf32>
    %cst_108 = arith.constant 0.000000e+00 : f32
    %115 = vector.broadcast %cst_108 : f32 to vector<8x128xf32>
    %116 = arith.maximumf %114, %115 : vector<8x128xf32>
    %c1_109 = arith.constant 1 : index
    %c4_110 = arith.constant 4 : index
    %c0_111 = arith.constant 0 : index
    %c0_112 = arith.constant 0 : index
    %117 = vector.load %arg4[%c1_109, %c4_110, %c0_111, %c0_112] : memref<2x6x128x128xf32, #tpu.memory_space<vmem>>, vector<1x1x128x128xf32>
    %118 = vector.shape_cast %117 : vector<1x1x128x128xf32> to vector<128x128xf32>
    %cst_113 = arith.constant dense<0.000000e+00> : vector<8x128xf32>
    %119 = tpu.matmul %116, %118, %cst_113 {dimension_numbers = #tpu.dot_dimension_numbers<[1], [0], [0], [1], [0, 0, 1, 1], [], []>} : vector<8x128xf32>, vector<128x128xf32>, vector<8x128xf32> -> vector<8x128xf32>
    %c1_114 = arith.constant 1 : index
    %c4_115 = arith.constant 4 : index
    %c0_116 = arith.constant 0 : index
    %c0_117 = arith.constant 0 : index
    %120 = vector.load %arg5[%c1_114, %c4_115, %c0_116, %c0_117] : memref<2x6x1x128xf32, #tpu.memory_space<vmem>>, vector<1x1x1x128xf32>
    %121 = vector.shape_cast %120 : vector<1x1x1x128xf32> to vector<1x128xf32>
    %122 = vector.broadcast %121 : vector<1x128xf32> to vector<8x128xf32>
    %123 = arith.addf %119, %122 : vector<8x128xf32>
    %c1_118 = arith.constant 1 : index
    %c5_119 = arith.constant 5 : index
    %c0_120 = arith.constant 0 : index
    %c0_121 = arith.constant 0 : index
    %124 = vector.load %arg4[%c1_118, %c5_119, %c0_120, %c0_121] : memref<2x6x128x128xf32, #tpu.memory_space<vmem>>, vector<1x1x128x128xf32>
    %125 = vector.shape_cast %124 : vector<1x1x128x128xf32> to vector<128x128xf32>
    %cst_122 = arith.constant dense<0.000000e+00> : vector<8x128xf32>
    %126 = tpu.matmul %116, %125, %cst_122 {dimension_numbers = #tpu.dot_dimension_numbers<[1], [0], [0], [1], [0, 0, 1, 1], [], []>} : vector<8x128xf32>, vector<128x128xf32>, vector<8x128xf32> -> vector<8x128xf32>
    %c1_123 = arith.constant 1 : index
    %c5_124 = arith.constant 5 : index
    %c0_125 = arith.constant 0 : index
    %c0_126 = arith.constant 0 : index
    %127 = vector.load %arg5[%c1_123, %c5_124, %c0_125, %c0_126] : memref<2x6x1x128xf32, #tpu.memory_space<vmem>>, vector<1x1x1x128xf32>
    %128 = vector.shape_cast %127 : vector<1x1x1x128xf32> to vector<1x128xf32>
    %129 = vector.broadcast %128 : vector<1x128xf32> to vector<8x128xf32>
    %130 = arith.addf %126, %129 : vector<8x128xf32>
    %131 = math.exp %123 : vector<8x128xf32>
    %132 = arith.mulf %76, %131 : vector<8x128xf32>
    %133 = arith.addf %132, %130 : vector<8x128xf32>
    %134 = tpu.concatenate %75, %133 in 1 : vector<8x128xf32>, vector<8x128xf32> -> vector<8x256xf32>
    %c2_127 = arith.constant 2 : index
    %c0_128 = arith.constant 0 : index
    %c0_129 = arith.constant 0 : index
    %135 = vector.load %arg2[%c2_127, %c0_128, %c0_129] : memref<3x256x256xf32, #tpu.memory_space<vmem>>, vector<1x256x256xf32>
    %136 = vector.shape_cast %135 : vector<1x256x256xf32> to vector<256x256xf32>
    %cst_130 = arith.constant dense<0.000000e+00> : vector<8x256xf32>
    %137 = tpu.matmul %134, %136, %cst_130 {dimension_numbers = #tpu.dot_dimension_numbers<[1], [0], [0], [1], [0, 0, 1, 1], [], []>} : vector<8x256xf32>, vector<256x256xf32>, vector<8x256xf32> -> vector<8x256xf32>
    %c2_131 = arith.constant 2 : index
    %c0_132 = arith.constant 0 : index
    %c0_133 = arith.constant 0 : index
    %138 = vector.load %arg3[%c2_131, %c0_132, %c0_133] : memref<3x1x256xf32, #tpu.memory_space<vmem>>, vector<1x1x256xf32>
    %139 = vector.shape_cast %138 : vector<1x1x256xf32> to vector<1x256xf32>
    %140 = vector.broadcast %139 : vector<1x256xf32> to vector<8x256xf32>
    %141 = arith.addf %137, %140 : vector<8x256xf32>
    %c0_134 = arith.constant 0 : index
    %c0_135 = arith.constant 0 : index
    %142 = vector.load %arg6[%c0_134, %c0_135] : memref<8x256xf32, #tpu.memory_space<vmem>>, vector<8x256xf32>
    tpu.vector_store %arg6[%c0_134, %c0_135], %141 {strides = array<i32>} : memref<8x256xf32, #tpu.memory_space<vmem>>, vector<8x256xf32>,
    return
  }
  func.func @transform_0(%arg0: i32) -> (i32, i32) {
    %c0_i32 = arith.constant 0 : i32
    %c0_i32_0 = arith.constant 0 : i32
    return %arg0, %c0_i32 : i32, i32
  }
  func.func @transform_1(%arg0: i32) -> (i32, i32, i32) {
    %c0_i32 = arith.constant 0 : i32
    %c0_i32_0 = arith.constant 0 : i32
    %c0_i32_1 = arith.constant 0 : i32
    %c0_i32_2 = arith.constant 0 : i32
    return %c0_i32, %c0_i32_0, %c0_i32_1 : i32, i32, i32
  }
  func.func @transform_2(%arg0: i32) -> (i32, i32, i32) {
    %c0_i32 = arith.constant 0 : i32
    %c0_i32_0 = arith.constant 0 : i32
    %c0_i32_1 = arith.constant 0 : i32
    %c0_i32_2 = arith.constant 0 : i32
    return %c0_i32, %c0_i32_0, %c0_i32_1 : i32, i32, i32
  }
  func.func @transform_3(%arg0: i32) -> (i32, i32, i32, i32) {
    %c0_i32 = arith.constant 0 : i32
    %c0_i32_0 = arith.constant 0 : i32
    %c0_i32_1 = arith.constant 0 : i32
    %c0_i32_2 = arith.constant 0 : i32
    %c0_i32_3 = arith.constant 0 : i32
    return %c0_i32, %c0_i32_0, %c0_i32_1, %c0_i32_2 : i32, i32, i32, i32
  }
  func.func @transform_4(%arg0: i32) -> (i32, i32, i32, i32) {
    %c0_i32 = arith.constant 0 : i32
    %c0_i32_0 = arith.constant 0 : i32
    %c0_i32_1 = arith.constant 0 : i32
    %c0_i32_2 = arith.constant 0 : i32
    %c0_i32_3 = arith.constant 0 : i32
    return %c0_i32, %c0_i32_0, %c0_i32_1, %c0_i32_2 : i32, i32, i32, i32
  }
  func.func @transform_5(%arg0: i32) -> (i32, i32) {
    %c0_i32 = arith.constant 0 : i32
    %c0_i32_0 = arith.constant 0 : i32
    return %arg0, %c0_i32 : i32, i32
  }
}

</mosaic_0001>

<bundles_post_ra>
// kernel: tpu_custom_call.1
= control target key start
LH: loop header
LB: loop body
LE: loop exit
PB: predicated region body
PF: predicated region fallthrough
CT: control target
= control target key end

     0   :  { %10 = vsyncpa [#allocation3], 0  ;;  %s1388_s0 = inlined_call_operand.hbm [shape: f32[8,256], index: 0, kind: input, shape index: {}]   ;;  %s1389_s1 = inlined_call_operand.hbm [shape: f32[3,256,256], index: 1, kind: input, shape index: {}]   ;;  %s1390_s2 = inlined_call_operand.hbm [shape: f32[3,1,256], index: 2, kind: input, shape index: {}]   ;;  %s1391_s3 = inlined_call_operand.hbm [shape: f32[2,6,128,128], index: 3, kind: input, shape index: {}]   ;;  %s1392_s4 = inlined_call_operand.hbm [shape: f32[2,6,1,128], index: 4, kind: input, shape index: {}]   ;;  %s1393_s5 = inlined_call_operand.hbm [shape: f32[8,256], index: 5, kind: output, shape index: {}]  }
   0x1   :  { %11 = vsyncpa [#allocation6], 0 }
   0x2   :  { %12 = vsyncpa [#allocation9], 0  ;;  %s29_s20 = sshll.u32 %s1389_s1, 4  ;;  %s30_s20 = int_to_ptr.hbm [resolvable:$true] %s29_s20 }
   0x3   :  { %13 = vsyncpa [#allocation4], 0  ;;  %s1279_s21 = smov [#allocation5]   ;;  %s55_s25 = sshll.u32 %s1391_s3, 4  ;;  %s56_s25 = int_to_ptr.hbm [resolvable:$true] %s55_s25 }
   0x4   :  { %s31_s22 = sshll.u32 %s1279_s21, 4  ;;  %s1280_s26 = smov 256   ;;  %s32_s22 = int_to_ptr.vmem [resolvable:$true] %s31_s22 }
   0x5   :  { %s1281_s27 = smov 16   ;;  %s1282_s28 = smov [#allocation8]  }
   0x6   :  { %37 = dma.hbm_to_vmem [thread:$0]  %s30_s20, 24576, %s32_s22, [#allocation6], %s1280_s26, %s1280_s26, %s1281_s27  }
   0x7   :  { %s57_s29 = sshll.u32 %s1282_s28, 4  ;;  %s1283_s30 = smov 128   ;;  %s58_s29 = int_to_ptr.vmem [resolvable:$true] %s57_s29 }
   0x8   :  { %s1284_s6 = smov 8   ;;  %s19_s8 = sshll.u32 %s1388_s0, 4  ;;  %s20_s8 = int_to_ptr.hbm [resolvable:$true] %s19_s8 }
   0x9   :  { %63 = dma.hbm_to_vmem [thread:$0]  %s56_s25, 24576, %s58_s29, [#allocation9], %s1283_s30, %s1283_s30, %s1284_s6  }
   0xa   :  { %s1285_s9 = smov [#allocation2]   ;;  %s42_s12 = sshll.u32 %s1390_s2, 4  ;;  %s43_s12 = int_to_ptr.hbm [resolvable:$true] %s42_s12 }
   0xb   :  { %s21_s10 = sshll.u32 %s1285_s9, 4  ;;  %s1286_s13 = smov [#allocation7]   ;;  %s22_s10 = int_to_ptr.vmem [resolvable:$true] %s21_s10 }
   0xc   :  { %24 = dma.hbm_to_vmem [thread:$0]  %s20_s8, 256, %s22_s10, [#allocation3]  }
   0xd   :  { %s44_s14 = sshll.u32 %s1286_s13, 4  ;;  %s1287_s15 = smov 32   ;;  %s45_s14 = int_to_ptr.vmem [resolvable:$true] %s44_s14 }
   0xe   :  { %s1288_s16 = smov 2   ;;  %s68_s0 = sshll.u32 %s1392_s4, 4  ;;  %s69_s0 = int_to_ptr.hbm [resolvable:$true] %s68_s0 }
   0xf   :  { %50 = dma.hbm_to_vmem [thread:$0]  %s43_s12, 96, %s45_s14, [#allocation6], %s1287_s15, %s1287_s15, %s1288_s16  }
  0x10   :  { %s1289_s19 = smov [#allocation10]   ;;  %s1290_s21 = smov 1  }
  0x11   :  { %s70_s20 = sshll.u32 %s1289_s19, 4  ;;  %s71_s20 = int_to_ptr.vmem [resolvable:$true] %s70_s20 }
  0x12   :  { %76 = dma.hbm_to_vmem [thread:$0]  %s69_s0, 192, %s71_s20, [#allocation9], %s1281_s27, %s1281_s27, %s1290_s21  }
  0x13   :  { %1271 = dma.done.wait [#allocation3], 256  }
  0x14   :  { %1272 = vsyncadd [#allocation3], 4294967040 }
  0x15   :  { %1273 = dma.done.wait [#allocation6], 24672  }
  0x16   :  { %1274 = vsyncadd [#allocation6], 4294942624 }
  0x17   :  { %1275 = dma.done.wait [#allocation9], 24768  }
  0x18   :  { %1276 = vsyncadd [#allocation9], 4294942528  ;;  %v129_v0 = vld [vmem:[#allocation5 + $0xf0] sm:$0xff]  ;;  %v127_v1 = vld [vmem:[#allocation5 + $0xe0] sm:$0xff]  ;;  %s1291_s2 = smov [#allocation11]   ;;  %s1086_s24 = sshll.u32 %s1393_s5, 4  ;;  %s1087_s24 = int_to_ptr.hbm [resolvable:$true] %s1086_s24 }
  0x19   :  { %v161_v2 = vld [vmem:[#allocation5 + $0x1f0] sm:$0xff]  ;;  %169 = vmatpush.msra.mxu0 %v129_v0  ;;  %v159_v3 = vld [vmem:[#allocation5 + $0x1e0] sm:$0xff]  ;;  %v1342_v33 = vld [vmem:[#allocation2 + $0x8] sm:$0xff]  ;;  %s1084_s4 = sshll.u32 %s1291_s2, 4  ;;  %s1085_s4 = int_to_ptr.vmem [resolvable:$true] %s1084_s4 }
  0x1a   :  { %189 = vmatpush.msra.mxu1 %v161_v2  ;;  %v125_v4 = vld [vmem:[#allocation5 + $0xd0] sm:$0xff]  ;;  %v123_v6 = vld [vmem:[#allocation5 + $0xc0] sm:$0xff] }
  0x1b   :  { %v157_v5 = vld [vmem:[#allocation5 + $0x1d0] sm:$0xff]  ;;  %170 = vmatpush.msra.mxu0 %v127_v1  ;;  %v155_v7 = vld [vmem:[#allocation5 + $0x1c0] sm:$0xff] }
  0x1c   :  { %190 = vmatpush.msra.mxu1 %v159_v3  ;;  %v121_v8 = vld [vmem:[#allocation5 + $0xb0] sm:$0xff]  ;;  %v119_v10 = vld [vmem:[#allocation5 + $0xa0] sm:$0xff] }
  0x1d   :  { %171 = vmatpush.msra.mxu0 %v125_v4  ;;  %v153_v9 = vld [vmem:[#allocation5 + $0x1b0] sm:$0xff]  ;;  %v151_v11 = vld [vmem:[#allocation5 + $0x1a0] sm:$0xff] }
  0x1e   :  { %191 = vmatpush.msra.mxu1 %v157_v5  ;;  %v117_v12 = vld [vmem:[#allocation5 + $0x90] sm:$0xff]  ;;  %v115_v14 = vld [vmem:[#allocation5 + $0x80] sm:$0xff] }
  0x1f   :  { %172 = vmatpush.msra.mxu0 %v123_v6  ;;  %v149_v13 = vld [vmem:[#allocation5 + $0x190] sm:$0xff]  ;;  %v147_v15 = vld [vmem:[#allocation5 + $0x180] sm:$0xff] }
  0x20   :  { %192 = vmatpush.msra.mxu1 %v155_v7  ;;  %v113_v16 = vld [vmem:[#allocation5 + $0x70] sm:$0xff]  ;;  %v111_v18 = vld [vmem:[#allocation5 + $0x60] sm:$0xff] }
  0x21   :  { %173 = vmatpush.msra.mxu0 %v121_v8  ;;  %v145_v17 = vld [vmem:[#allocation5 + $0x170] sm:$0xff]  ;;  %v143_v19 = vld [vmem:[#allocation5 + $0x160] sm:$0xff] }
  0x22   :  { %193 = vmatpush.msra.mxu1 %v153_v9  ;;  %v109_v20 = vld [vmem:[#allocation5 + $0x50] sm:$0xff]  ;;  %v107_v22 = vld [vmem:[#allocation5 + $0x40] sm:$0xff]  ;;  %v130_v9 = vld [vmem:[#allocation5 + $0xf8] sm:$0xff] }
  0x23   :  { %174 = vmatpush.msra.mxu0 %v119_v10  ;;  %v141_v21 = vld [vmem:[#allocation5 + $0x150] sm:$0xff]  ;;  %v139_v23 = vld [vmem:[#allocation5 + $0x140] sm:$0xff]  ;;  %v128_v10 = vld [vmem:[#allocation5 + $0xe8] sm:$0xff]  ;;  %209 = vmatpush.msra.mxu2 %v130_v9 }
  0x24   :  { %194 = vmatpush.msra.mxu1 %v151_v11  ;;  %v105_v24 = vld [vmem:[#allocation5 + $0x30] sm:$0xff]  ;;  %v103_v26 = vld [vmem:[#allocation5 + $0x20] sm:$0xff]  ;;  %v126_v11 = vld [vmem:[#allocation5 + $0xd8] sm:$0xff] }
  0x25   :  { %175 = vmatpush.msra.mxu0 %v117_v12  ;;  %v137_v25 = vld [vmem:[#allocation5 + $0x130] sm:$0xff]  ;;  %v135_v27 = vld [vmem:[#allocation5 + $0x120] sm:$0xff]  ;;  %210 = vmatpush.msra.mxu2 %v128_v10  ;;  %v124_v12 = vld [vmem:[#allocation5 + $0xc8] sm:$0xff] }
  0x26   :  { %195 = vmatpush.msra.mxu1 %v149_v13  ;;  %v101_v28 = vld [vmem:[#allocation5 + $0x10] sm:$0xff]  ;;  %v99_v30 = vld [vmem:[#allocation5] sm:$0xff]  ;;  %v122_v13 = vld [vmem:[#allocation5 + $0xb8] sm:$0xff] }
  0x27   :  { %176 = vmatpush.msra.mxu0 %v115_v14  ;;  %v133_v29 = vld [vmem:[#allocation5 + $0x110] sm:$0xff]  ;;  %v131_v31 = vld [vmem:[#allocation5 + $0x100] sm:$0xff]  ;;  %211 = vmatpush.msra.mxu2 %v126_v11  ;;  %v120_v14 = vld [vmem:[#allocation5 + $0xa8] sm:$0xff] }
  0x28   :  { %196 = vmatpush.msra.mxu1 %v147_v15  ;;  %v1340_v32 = vld [vmem:[#allocation2] sm:$0xff]  ;;  %v265_v34 = vld [vmem:[#allocation8 + $0x78] sm:$0xff]  ;;  %v262_v37 = vld [vmem:[#allocation8 + $0x60] sm:$0xff] }
  0x29   :  { %177 = vmatpush.msra.mxu0 %v113_v16  ;;  %v264_v35 = vld [vmem:[#allocation8 + $0x70] sm:$0xff]  ;;  %v263_v36 = vld [vmem:[#allocation8 + $0x68] sm:$0xff]  ;;  %v261_v38 = vld [vmem:[#allocation8 + $0x58] sm:$0xff]  ;;  %212 = vmatpush.msra.mxu2 %v124_v12 }
  0x2a   :  { %197 = vmatpush.msra.mxu1 %v145_v17  ;;  %v260_v39 = vld [vmem:[#allocation8 + $0x50] sm:$0xff]  ;;  %v259_v40 = vld [vmem:[#allocation8 + $0x48] sm:$0xff]  ;;  %v258_v41 = vld [vmem:[#allocation8 + $0x40] sm:$0xff] }
  0x2b   :  { %178 = vmatpush.msra.mxu0 %v111_v18  ;;  %v257_v42 = vld [vmem:[#allocation8 + $0x38] sm:$0xff]  ;;  %v256_v43 = vld [vmem:[#allocation8 + $0x30] sm:$0xff]  ;;  %v255_v44 = vld [vmem:[#allocation8 + $0x28] sm:$0xff]  ;;  %213 = vmatpush.msra.mxu2 %v122_v13 }
  0x2c   :  { %198 = vmatpush.msra.mxu1 %v143_v19  ;;  %v254_v45 = vld [vmem:[#allocation8 + $0x20] sm:$0xff]  ;;  %v253_v46 = vld [vmem:[#allocation8 + $0x18] sm:$0xff]  ;;  %v252_v47 = vld [vmem:[#allocation8 + $0x10] sm:$0xff] }
  0x2d   :  { %179 = vmatpush.msra.mxu0 %v109_v20  ;;  %v251_v48 = vld [vmem:[#allocation8 + $0x8] sm:$0xff]  ;;  %v250_v49 = vld [vmem:[#allocation8] sm:$0xff]  ;;  %v307_v50 = vld [vmem:[#allocation8 + $0xf8] sm:$0xff]  ;;  %214 = vmatpush.msra.mxu2 %v120_v14 }
  0x2e   :  { %199 = vmatpush.msra.mxu1 %v141_v21  ;;  %v306_v51 = vld [vmem:[#allocation8 + $0xf0] sm:$0xff]  ;;  %v305_v52 = vld [vmem:[#allocation8 + $0xe8] sm:$0xff]  ;;  %v304_v53 = vld [vmem:[#allocation8 + $0xe0] sm:$0xff] }
  0x2f   :  { %180 = vmatpush.msra.mxu0 %v107_v22  ;;  %v303_v54 = vld [vmem:[#allocation8 + $0xd8] sm:$0xff]  ;;  %v302_v55 = vld [vmem:[#allocation8 + $0xd0] sm:$0xff]  ;;  %v301_v56 = vld [vmem:[#allocation8 + $0xc8] sm:$0xff] }
  0x30   :  { %200 = vmatpush.msra.mxu1 %v139_v23  ;;  %v300_v57 = vld [vmem:[#allocation8 + $0xc0] sm:$0xff]  ;;  %v299_v58 = vld [vmem:[#allocation8 + $0xb8] sm:$0xff]  ;;  %v298_v59 = vld [vmem:[#allocation8 + $0xb0] sm:$0xff] }
  0x31   :  { %181 = vmatpush.msra.mxu0 %v105_v24  ;;  %v297_v60 = vld [vmem:[#allocation8 + $0xa8] sm:$0xff]  ;;  %v1346_v61 = vld [vmem:[#allocation7] sm:$0x3]  ;;  %v296_v62 = vld [vmem:[#allocation8 + $0xa0] sm:$0xff] }
  0x32   :  { %201 = vmatpush.msra.mxu1 %v137_v25  ;;  %v165_v63 = vperm.slane %v1346_v61, 0  ;;  %v295_v0 = vld [vmem:[#allocation8 + $0x98] sm:$0xff]  ;;  %v294_v6 = vld [vmem:[#allocation8 + $0x90] sm:$0xff]  ;;  %v293_v7 = vld [vmem:[#allocation8 + $0x88] sm:$0xff] }
  0x33   :  { %182 = vmatpush.msra.mxu0 %v103_v26  ;;  %v292_v8 = vld [vmem:[#allocation8 + $0x80] sm:$0xff]  ;;  %v118_v15 = vld [vmem:[#allocation5 + $0x98] sm:$0xff]  ;;  %v521_v9 = vld [vmem:[#allocation5 + $0x250] sm:$0xff] }
  0x34   :  { %202 = vmatpush.msra.mxu1 %v135_v27  ;;  %v116_v16 = vld [vmem:[#allocation5 + $0x88] sm:$0xff]  ;;  %215 = vmatpush.msra.mxu2 %v118_v15  ;;  %v114_v17 = vld [vmem:[#allocation5 + $0x78] sm:$0xff]  ;;  %v1111_v26 = vld [vmem:[#allocation10] ss:$0 sm:$0xff] }
  0x35   :  { %183 = vmatpush.msra.mxu0 %v101_v28  ;;  %v112_v18 = vld [vmem:[#allocation5 + $0x68] sm:$0xff]  ;;  %v162_v19 = vld [vmem:[#allocation5 + $0x1f8] sm:$0xff]  ;;  %v519_v10 = vld [vmem:[#allocation5 + $0x240] sm:$0xff] }
  0x36   :  { %203 = vmatpush.msra.mxu1 %v133_v29  ;;  %216 = vmatpush.msra.mxu2 %v116_v16  ;;  %v110_v20 = vld [vmem:[#allocation5 + $0x58] sm:$0xff]  ;;  %v160_v21 = vld [vmem:[#allocation5 + $0x1e8] sm:$0xff]  ;;  %v517_v11 = vld [vmem:[#allocation5 + $0x230] sm:$0xff] }
  0x37   :  { %184 = vmatpush.msra.mxu0 %v99_v30  ;;  %229 = vmatpush.msra.mxu3 %v162_v19  ;;  %v108_v22 = vld [vmem:[#allocation5 + $0x48] sm:$0xff]  ;;  %v158_v23 = vld [vmem:[#allocation5 + $0x1d8] sm:$0xff]  ;;  %v515_v12 = vld [vmem:[#allocation5 + $0x220] sm:$0xff] }
  0x38   :  { %204 = vmatpush.msra.mxu1 %v131_v31  ;;  %185 = vmatmul.f32.vlgmr.msra.gmra.mxu0 %v1340_v32  ;;  %v106_v24 = vld [vmem:[#allocation5 + $0x38] sm:$0xff]  ;;  %v156_v25 = vld [vmem:[#allocation5 + $0x1c8] sm:$0xff]  ;;  %v513_v13 = vld [vmem:[#allocation5 + $0x210] sm:$0xff] }
  0x39   :  { %205 = vmatmul.f32.vlgmr.msra.gmra.mxu1 %v1342_v33  ;;  %270 = vmatpush.msrb.mxu0 %v265_v34  ;;  %v104_v27 = vld [vmem:[#allocation5 + $0x28] sm:$0xff]  ;;  %v154_v28 = vld [vmem:[#allocation5 + $0x1b8] sm:$0xff]  ;;  %v511_v14 = vld [vmem:[#allocation5 + $0x200] sm:$0xff] }
  0x3a   :  { %313 = vmatpush.msrb.mxu1 %v307_v50  ;;  %217 = vmatpush.msra.mxu2 %v114_v17  ;;  %v102_v29 = vld [vmem:[#allocation5 + $0x18] sm:$0xff]  ;;  %v152_v30 = vld [vmem:[#allocation5 + $0x1a8] sm:$0xff] }
  0x3b   :  { %271 = vmatpush.msrb.mxu0 %v264_v35  ;;  %230 = vmatpush.msra.mxu3 %v160_v21  ;;  %v100_v35 = vld [vmem:[#allocation5 + $0x8] sm:$0xff]  ;;  %v394_v15 = vld [vmem:[#allocation8 + $0x1f8] sm:$0xff]  ;;  %v393_v16 = vld [vmem:[#allocation8 + $0x1f0] sm:$0xff] }
  0x3c   :  { %314 = vmatpush.msrb.mxu1 %v306_v51  ;;  %218 = vmatpush.msra.mxu2 %v112_v18  ;;  %v345_v50 = vld [vmem:[#allocation8 + $0x148] sm:$0xff]  ;;  %v391_v18 = vld [vmem:[#allocation8 + $0x1e0] sm:$0xff]  ;;  %v390_v19 = vld [vmem:[#allocation8 + $0x1d8] sm:$0xff] }
  0x3d   :  { %272 = vmatpush.msrb.mxu0 %v263_v36  ;;  %231 = vmatpush.msra.mxu3 %v158_v23  ;;  %v150_v36 = vld [vmem:[#allocation5 + $0x198] sm:$0xff]  ;;  %v136_v51 = vld [vmem:[#allocation5 + $0x128] sm:$0xff]  ;;  %v1112_v23 = vld [vmem:[#allocation10 + $0x1] ss:$0 sm:$0xff] }
  0x3e   :  { %315 = vmatpush.msrb.mxu1 %v305_v52  ;;  %219 = vmatpush.msra.mxu2 %v110_v20  ;;  %v134_v52 = vld [vmem:[#allocation5 + $0x118] sm:$0xff]  ;;  %v392_v17 = vld [vmem:[#allocation8 + $0x1e8] sm:$0xff] }
  0x3f   :  { %273 = vmatpush.msrb.mxu0 %v262_v37  ;;  %232 = vmatpush.msra.mxu3 %v156_v25  ;;  %v351_v37 = vld [vmem:[#allocation8 + $0x178] sm:$0xff]  ;;  %v389_v20 = vld [vmem:[#allocation8 + $0x1d0] sm:$0xff]  ;;  %v388_v21 = vld [vmem:[#allocation8 + $0x1c8] sm:$0xff] }
  0x40   :  { %316 = vmatpush.msrb.mxu1 %v304_v53  ;;  %220 = vmatpush.msra.mxu2 %v108_v22  ;;  %v343_v53 = vld [vmem:[#allocation8 + $0x138] sm:$0xff]  ;;  %v387_v22 = vld [vmem:[#allocation8 + $0x1c0] sm:$0xff]  ;;  %v385_v25 = vld [vmem:[#allocation8 + $0x1b0] sm:$0xff] }
  0x41   :  { %274 = vmatpush.msrb.mxu0 %v261_v38  ;;  %233 = vmatpush.msra.mxu3 %v154_v28  ;;  %v384_v28 = vld [vmem:[#allocation8 + $0x1a8] sm:$0xff] }
  0x42   :  { %317 = vmatpush.msrb.mxu1 %v303_v54  ;;  %221 = vmatpush.msra.mxu2 %v106_v24  ;;  %v132_v54 = vld [vmem:[#allocation5 + $0x108] sm:$0xff]  ;;  %v386_v24 = vld [vmem:[#allocation8 + $0x1b8] sm:$0xff] }
  0x43   :  { %275 = vmatpush.msrb.mxu0 %v260_v39  ;;  %234 = vmatpush.msra.mxu3 %v152_v30  ;;  %v148_v39 = vld [vmem:[#allocation5 + $0x188] sm:$0xff] }
  0x44   :  { %318 = vmatpush.msrb.mxu1 %v302_v55  ;;  %222 = vmatpush.msra.mxu2 %v104_v27  ;;  %v342_v55 = vld [vmem:[#allocation8 + $0x130] sm:$0xff]  ;;  %v383_v30 = vld [vmem:[#allocation8 + $0x1a0] sm:$0xff] }
  0x45   :  { %276 = vmatpush.msrb.mxu0 %v259_v40  ;;  %235 = vmatpush.msra.mxu3 %v150_v36  ;;  %v350_v40 = vld [vmem:[#allocation8 + $0x170] sm:$0xff]  ;;  %v380_v36 = vld [vmem:[#allocation8 + $0x188] sm:$0xff] }
  0x46   :  { %319 = vmatpush.msrb.mxu1 %v301_v56  ;;  %223 = vmatpush.msra.mxu2 %v102_v29  ;;  %v341_v56 = vld [vmem:[#allocation8 + $0x128] sm:$0xff] }
  0x47   :  { %277 = vmatpush.msrb.mxu0 %v258_v41  ;;  %236 = vmatpush.msra.mxu3 %v148_v39  ;;  %v146_v41 = vld [vmem:[#allocation5 + $0x178] sm:$0xff] }
  0x48   :  { %320 = vmatpush.msrb.mxu1 %v300_v57  ;;  %224 = vmatpush.msra.mxu2 %v100_v35  ;;  %v340_v57 = vld [vmem:[#allocation8 + $0x120] sm:$0xff]  ;;  %v381_v35 = vld [vmem:[#allocation8 + $0x190] sm:$0xff] }
  0x49   :  { %278 = vmatpush.msrb.mxu0 %v257_v42  ;;  %v349_v42 = vld [vmem:[#allocation8 + $0x168] sm:$0xff]  ;;  %225 = vmatmul.f32.vlgmr.msra.gmra.mxu2 %v1340_v32  ;;  %v344_v32 = vld [vmem:[#allocation8 + $0x140] sm:$0xff]  ;;  %v437_v39 = vld [vmem:[#allocation8 + $0x270] sm:$0xff] }
  0x4a   :  { %321 = vmatpush.msrb.mxu1 %v299_v58  ;;  %357 = vmatpush.msrb.mxu2 %v351_v37  ;;  %v339_v58 = vld [vmem:[#allocation8 + $0x118] sm:$0xff]  ;;  %v379_v37 = vld [vmem:[#allocation8 + $0x180] sm:$0xff] }
  0x4b   :  { %279 = vmatpush.msrb.mxu0 %v256_v43  ;;  %237 = vmatpush.msra.mxu3 %v146_v41  ;;  %v144_v43 = vld [vmem:[#allocation5 + $0x168] sm:$0xff] }
  0x4c   :  { %322 = vmatpush.msrb.mxu1 %v298_v59  ;;  %358 = vmatpush.msrb.mxu2 %v350_v40  ;;  %v338_v59 = vld [vmem:[#allocation8 + $0x110] sm:$0xff]  ;;  %v436_v40 = vld [vmem:[#allocation8 + $0x268] sm:$0xff]  ;;  %v435_v41 = vld [vmem:[#allocation8 + $0x260] sm:$0xff] }
  0x4d   :  { %280 = vmatpush.msrb.mxu0 %v255_v44  ;;  %v348_v44 = vld [vmem:[#allocation8 + $0x160] sm:$0xff]  ;;  %238 = vmatpush.msra.mxu3 %v144_v43  ;;  %v479_v43 = vld [vmem:[#allocation8 + $0x2f0] sm:$0xff] }
  0x4e   :  { %323 = vmatpush.msrb.mxu1 %v297_v60  ;;  %359 = vmatpush.msrb.mxu2 %v349_v42  ;;  %v337_v60 = vld [vmem:[#allocation8 + $0x108] sm:$0xff]  ;;  %v480_v42 = vld [vmem:[#allocation8 + $0x2f8] sm:$0xff] }
  0x4f   :  { %281 = vmatpush.msrb.mxu0 %v254_v45  ;;  %v142_v45 = vld [vmem:[#allocation5 + $0x158] sm:$0xff] }
  0x50   :  { %324 = vmatpush.msrb.mxu1 %v296_v62  ;;  %239 = vmatpush.msra.mxu3 %v142_v45  ;;  %v336_v62 = vld [vmem:[#allocation8 + $0x100] sm:$0xff]  ;;  %v478_v45 = vld [vmem:[#allocation8 + $0x2e8] sm:$0xff] }
  0x51   :  { %282 = vmatpush.msrb.mxu0 %v253_v46  ;;  %v347_v46 = vld [vmem:[#allocation8 + $0x158] sm:$0xff]  ;;  %360 = vmatpush.msrb.mxu2 %v348_v44 }
  0x52   :  { %325 = vmatpush.msrb.mxu1 %v295_v0  ;;  %v539_v0 = vld [vmem:[#allocation5 + $0x2e0] sm:$0xff] }
  0x53   :  { %283 = vmatpush.msrb.mxu0 %v252_v47  ;;  %v140_v47 = vld [vmem:[#allocation5 + $0x148] sm:$0xff]  ;;  %361 = vmatpush.msrb.mxu2 %v347_v46  ;;  %v434_v44 = vld [vmem:[#allocation8 + $0x258] sm:$0xff]  ;;  %v433_v46 = vld [vmem:[#allocation8 + $0x250] sm:$0xff] }
  0x54   :  { %326 = vmatpush.msrb.mxu1 %v294_v6  ;;  %240 = vmatpush.msra.mxu3 %v140_v47  ;;  %v527_v6 = vld [vmem:[#allocation5 + $0x280] sm:$0xff] }
  0x55   :  { %284 = vmatpush.msrb.mxu0 %v251_v48  ;;  %v346_v48 = vld [vmem:[#allocation8 + $0x150] sm:$0xff]  ;;  %v477_v47 = vld [vmem:[#allocation8 + $0x2e0] sm:$0xff] }
  0x56   :  { %327 = vmatpush.msrb.mxu1 %v293_v7  ;;  %362 = vmatpush.msrb.mxu2 %v346_v48  ;;  %v525_v7 = vld [vmem:[#allocation5 + $0x270] sm:$0xff] }
  0x57   :  { %285 = vmatpush.msrb.mxu0 %v250_v49  ;;  %v138_v49 = vld [vmem:[#allocation5 + $0x138] sm:$0xff]  ;;  %v432_v48 = vld [vmem:[#allocation8 + $0x248] sm:$0xff] }
  0x58   :  { %328 = vmatpush.msrb.mxu1 %v292_v8  ;;  %241 = vmatpush.msra.mxu3 %v138_v49  ;;  %v523_v8 = vld [vmem:[#allocation5 + $0x260] sm:$0xff] }
  0x59   :  { %363 = vmatpush.msrb.mxu2 %v345_v50  ;;  %v476_v49 = vld [vmem:[#allocation8 + $0x2d8] sm:$0xff]  ;;  %v431_v50 = vld [vmem:[#allocation8 + $0x240] sm:$0xff] }
  0x5a   :  { %242 = vmatpush.msra.mxu3 %v136_v51  ;;  %486 = vmatpush.msra.mxu1 %v480_v42  ;;  %v475_v51 = vld [vmem:[#allocation8 + $0x2d0] sm:$0xff] }
  0x5b   :  { %364 = vmatpush.msrb.mxu2 %v344_v32 }
  0x5c   :  { %243 = vmatpush.msra.mxu3 %v134_v52  ;;  %487 = vmatpush.msra.mxu1 %v479_v43  ;;  %v430_v52 = vld [vmem:[#allocation8 + $0x238] sm:$0xff]  ;;  %v561_v43 = vld [vmem:[#allocation5 + $0x390] sm:$0xff] }
  0x5d   :  { %365 = vmatpush.msrb.mxu2 %v343_v53  ;;  %v474_v53 = vld [vmem:[#allocation8 + $0x2c8] sm:$0xff] }
  0x5e   :  { %244 = vmatpush.msra.mxu3 %v132_v54  ;;  %488 = vmatpush.msra.mxu1 %v478_v45  ;;  %v429_v54 = vld [vmem:[#allocation8 + $0x230] sm:$0xff]  ;;  %v559_v45 = vld [vmem:[#allocation5 + $0x380] sm:$0xff] }
  0x5f   :  { %245 = vmatmul.f32.vlgmr.msra.gmra.mxu3 %v1342_v33  ;;  %366 = vmatpush.msrb.mxu2 %v342_v55  ;;  %v533_v33 = vld [vmem:[#allocation5 + $0x2b0] sm:$0xff]  ;;  %v473_v55 = vld [vmem:[#allocation8 + $0x2c0] sm:$0xff] }
  0x60   :  { %400 = vmatpush.msrb.mxu3 %v394_v15  ;;  %489 = vmatpush.msra.mxu1 %v477_v47  ;;  %v468_v15 = vld [vmem:[#allocation8 + $0x298] sm:$0xff]  ;;  %v1114_v47 = vld [vmem:[#allocation10 + $0x3] ss:$0 sm:$0xff] }
  0x61   :  { %367 = vmatpush.msrb.mxu2 %v341_v56  ;;  %v428_v56 = vld [vmem:[#allocation8 + $0x228] sm:$0xff] }
  0x62   :  { %401 = vmatpush.msrb.mxu3 %v393_v16  ;;  %490 = vmatpush.msra.mxu1 %v476_v49  ;;  %v526_v16 = vld [vmem:[#allocation5 + $0x278] sm:$0xff] }
  0x63   :  { %368 = vmatpush.msrb.mxu2 %v340_v57  ;;  %v472_v57 = vld [vmem:[#allocation8 + $0x2b8] sm:$0xff] }
  0x64   :  { %402 = vmatpush.msrb.mxu3 %v392_v17  ;;  %491 = vmatpush.msra.mxu1 %v475_v51  ;;  %v467_v17 = vld [vmem:[#allocation8 + $0x290] sm:$0xff] }
  0x65   :  { %369 = vmatpush.msrb.mxu2 %v339_v58  ;;  %v1113_v58 = vld [vmem:[#allocation10 + $0x2] ss:$0 sm:$0xff] }
  0x66   :  { %403 = vmatpush.msrb.mxu3 %v391_v18  ;;  %492 = vmatpush.msra.mxu1 %v474_v53  ;;  %v524_v18 = vld [vmem:[#allocation5 + $0x268] sm:$0xff]  ;;  %v558_v53 = vld [vmem:[#allocation5 + $0x378] sm:$0xff] }
  0x67   :  { %370 = vmatpush.msrb.mxu2 %v338_v59  ;;  %v427_v59 = vld [vmem:[#allocation8 + $0x220] sm:$0xff] }
  0x68   :  { %404 = vmatpush.msrb.mxu3 %v390_v19  ;;  %493 = vmatpush.msra.mxu1 %v473_v55  ;;  %v466_v19 = vld [vmem:[#allocation8 + $0x288] sm:$0xff] }
  0x69   :  { %371 = vmatpush.msrb.mxu2 %v337_v60  ;;  %v471_v60 = vld [vmem:[#allocation8 + $0x2b0] sm:$0xff]  ;;  %v556_v55 = vld [vmem:[#allocation5 + $0x368] sm:$0xff] }
  0x6a   :  { %405 = vmatpush.msrb.mxu3 %v389_v20  ;;  %494 = vmatpush.msra.mxu1 %v472_v57  ;;  %v522_v20 = vld [vmem:[#allocation5 + $0x258] sm:$0xff] }
  0x6b   :  { %372 = vmatpush.msrb.mxu2 %v336_v62  ;;  %v426_v62 = vld [vmem:[#allocation8 + $0x218] sm:$0xff] }
  0x6c   :  { %406 = vmatpush.msrb.mxu3 %v388_v21  ;;  %495 = vmatpush.msra.mxu1 %v471_v60  ;;  %v465_v21 = vld [vmem:[#allocation8 + $0x280] sm:$0xff]  ;;  %v554_v57 = vld [vmem:[#allocation5 + $0x358] sm:$0xff] }
  0x6d   :  { %v550_v60 = vld [vmem:[#allocation5 + $0x338] sm:$0xff] }
  0x6e   :  { %407 = vmatpush.msrb.mxu3 %v387_v22  ;;  %v520_v22 = vld [vmem:[#allocation5 + $0x248] sm:$0xff] }
  0x70   :  { %408 = vmatpush.msrb.mxu3 %v386_v24  ;;  %v516_v24 = vld [vmem:[#allocation5 + $0x228] sm:$0xff] }
  0x72   :  { %409 = vmatpush.msrb.mxu3 %v385_v25  ;;  %v514_v25 = vld [vmem:[#allocation5 + $0x218] sm:$0xff] }
  0x74   :  { %410 = vmatpush.msrb.mxu3 %v384_v28  ;;  %v574_v28 = vld [vmem:[#allocation5 + $0x3f8] sm:$0xff] }
  0x76   :  { %411 = vmatpush.msrb.mxu3 %v383_v30  ;;  %v571_v30 = vld [vmem:[#allocation5 + $0x3e0] sm:$0xff] }
  0xb5   :  { %v186_v1 = vpop.f32.mrf.mxu0 }
  0xb6   :  { %v206_v2 = vpop.f32.mrf.mxu1  ;;  %v187_v3 = vadd.f32 %v186_v1, %v165_v63  ;;  %v541_v63 = vld [vmem:[#allocation5 + $0x2f0] sm:$0xff] }
  0xb7   :  { %582 = vmatpush.msra.mxu2 %v541_v63  ;;  %v537_v1 = vld [vmem:[#allocation5 + $0x2d0] sm:$0xff] }
  0xb8   :  { %v1349_v4 = vadd.f32 %v206_v2, %v187_v3  ;;  %v535_v2 = vld [vmem:[#allocation5 + $0x2c0] sm:$0xff]  ;;  %v470_v63 = vld [vmem:[#allocation8 + $0x2a8] sm:$0xff] }
  0xb9   :  { %583 = vmatpush.msra.mxu2 %v539_v0  ;;  %v531_v3 = vld [vmem:[#allocation5 + $0x2a0] sm:$0xff]  ;;  %496 = vmatpush.msra.mxu1 %v470_v63  ;;  %v545_v63 = vld [vmem:[#allocation5 + $0x310] sm:$0xff] }
  0xba   :  { %v249_v5 = vmax.f32 %v1349_v4, 0.0 }
  0xbb   :  { %584 = vmatpush.msra.mxu2 %v537_v1 }
  0xbc   :  { %286 = vmatmul.f32.vlgmr.msrb.gmra.mxu0 %v249_v5  ;;  %v529_v5 = vld [vmem:[#allocation5 + $0x290] sm:$0xff] }
  0xbd   :  { %585 = vmatpush.msra.mxu2 %v535_v2  ;;  %v425_v2 = vld [vmem:[#allocation8 + $0x210] sm:$0xff] }
  0xbf   :  { %586 = vmatpush.msra.mxu2 %v533_v33  ;;  %v469_v33 = vld [vmem:[#allocation8 + $0x2a0] sm:$0xff] }
  0xc0   :  { %497 = vmatpush.msra.mxu1 %v469_v33  ;;  %v679_v33 = vld [vmem:[#allocation8 + $0x378] sm:$0xff] }
  0xc1   :  { %587 = vmatpush.msra.mxu2 %v531_v3 }
  0xc2   :  { %498 = vmatpush.msra.mxu1 %v468_v15 }
  0xc3   :  { %588 = vmatpush.msra.mxu2 %v529_v5  ;;  %v424_v5 = vld [vmem:[#allocation8 + $0x208] sm:$0xff] }
  0xc4   :  { %499 = vmatpush.msra.mxu1 %v467_v17 }
  0xc5   :  { %589 = vmatpush.msra.mxu2 %v527_v6  ;;  %v423_v6 = vld [vmem:[#allocation8 + $0x200] sm:$0xff] }
  0xc6   :  { %500 = vmatpush.msra.mxu1 %v466_v19  ;;  %v1116_v19 = vld [vmem:[#allocation10 + $0x5] ss:$0 sm:$0xff] }
  0xc7   :  { %590 = vmatpush.msra.mxu2 %v525_v7  ;;  %v542_v7 = vld [vmem:[#allocation5 + $0x2f8] sm:$0xff] }
  0xc8   :  { %501 = vmatpush.msra.mxu1 %v465_v21 }
  0xc9   :  { %591 = vmatpush.msra.mxu2 %v523_v8  ;;  %v540_v8 = vld [vmem:[#allocation5 + $0x2e8] sm:$0xff] }
  0xcb   :  { %592 = vmatpush.msra.mxu2 %v521_v9  ;;  %v538_v9 = vld [vmem:[#allocation5 + $0x2d8] sm:$0xff] }
  0xcc   :  { %v1359_v32 = vpop.f32.mrf.mxu2 }
  0xcd   :  { %593 = vmatpush.msra.mxu2 %v519_v10  ;;  %v536_v10 = vld [vmem:[#allocation5 + $0x2c8] sm:$0xff] }
  0xcf   :  { %594 = vmatpush.msra.mxu2 %v517_v11  ;;  %v534_v11 = vld [vmem:[#allocation5 + $0x2b8] sm:$0xff] }
  0xd1   :  { %595 = vmatpush.msra.mxu2 %v515_v12  ;;  %v532_v12 = vld [vmem:[#allocation5 + $0x2a8] sm:$0xff] }
  0xd3   :  { %596 = vmatpush.msra.mxu2 %v513_v13  ;;  %v530_v13 = vld [vmem:[#allocation5 + $0x298] sm:$0xff] }
  0xd5   :  { %597 = vmatpush.msra.mxu2 %v511_v14  ;;  %v528_v14 = vld [vmem:[#allocation5 + $0x288] sm:$0xff] }
  0xe2   :  { %v1361_v42 = vpop.f32.mrf.mxu3 }
 0x139   :  { %v287_v31 = vpop.f32.mrf.mxu0 }
 0x13a   :  { %v288_v34 = vadd.f32 %v1111_v26, %v287_v31 }
 0x13c   :  { %v290_v38 = vmax.f32 %v288_v34, 0.0  ;;  %v382_v34 = vld [vmem:[#allocation8 + $0x198] sm:$0xff] }
 0x13d   :  { %412 = vmatpush.msrb.mxu3 %v382_v34  ;;  %v569_v34 = vld [vmem:[#allocation5 + $0x3d0] sm:$0xff] }
 0x13e   :  { %329 = vmatmul.f32.vlgmr.msrb.gmra.mxu1 %v290_v38  ;;  %v438_v38 = vld [vmem:[#allocation8 + $0x278] sm:$0xff] }
 0x13f   :  { %413 = vmatpush.msrb.mxu3 %v381_v35  ;;  %444 = vmatpush.msra.mxu0 %v438_v38  ;;  %v570_v35 = vld [vmem:[#allocation5 + $0x3d8] sm:$0xff]  ;;  %v565_v38 = vld [vmem:[#allocation5 + $0x3b0] sm:$0xff] }
 0x140   :  { %642 = vmatpush.msrb.mxu1 %v574_v28  ;;  %v667_v28 = vld [vmem:[#allocation8 + $0x318] sm:$0xff] }
 0x141   :  { %414 = vmatpush.msrb.mxu3 %v380_v36  ;;  %445 = vmatpush.msra.mxu0 %v437_v39  ;;  %v567_v36 = vld [vmem:[#allocation5 + $0x3c0] sm:$0xff]  ;;  %v566_v39 = vld [vmem:[#allocation5 + $0x3b8] sm:$0xff] }
 0x143   :  { %415 = vmatpush.msrb.mxu3 %v379_v37  ;;  %446 = vmatpush.msra.mxu0 %v436_v40  ;;  %v568_v37 = vld [vmem:[#allocation5 + $0x3c8] sm:$0xff]  ;;  %v563_v40 = vld [vmem:[#allocation5 + $0x3a0] sm:$0xff] }
 0x145   :  { %447 = vmatpush.msra.mxu0 %v435_v41  ;;  %v564_v41 = vld [vmem:[#allocation5 + $0x3a8] sm:$0xff] }
 0x147   :  { %448 = vmatpush.msra.mxu0 %v434_v44  ;;  %v562_v44 = vld [vmem:[#allocation5 + $0x398] sm:$0xff] }
 0x149   :  { %449 = vmatpush.msra.mxu0 %v433_v46  ;;  %v560_v46 = vld [vmem:[#allocation5 + $0x388] sm:$0xff] }
 0x14b   :  { %450 = vmatpush.msra.mxu0 %v432_v48 }
 0x14d   :  { %451 = vmatpush.msra.mxu0 %v431_v50 }
 0x14f   :  { %452 = vmatpush.msra.mxu0 %v430_v52  ;;  %v557_v52 = vld [vmem:[#allocation5 + $0x370] sm:$0xff] }
 0x151   :  { %453 = vmatpush.msra.mxu0 %v429_v54  ;;  %v555_v54 = vld [vmem:[#allocation5 + $0x360] sm:$0xff] }
 0x153   :  { %454 = vmatpush.msra.mxu0 %v428_v56  ;;  %v553_v56 = vld [vmem:[#allocation5 + $0x350] sm:$0xff] }
 0x155   :  { %455 = vmatpush.msra.mxu0 %v427_v59  ;;  %v552_v59 = vld [vmem:[#allocation5 + $0x348] sm:$0xff] }
 0x157   :  { %456 = vmatpush.msra.mxu0 %v426_v62  ;;  %v548_v62 = vld [vmem:[#allocation5 + $0x328] sm:$0xff] }
 0x159   :  { %457 = vmatpush.msra.mxu0 %v425_v2  ;;  %v544_v2 = vld [vmem:[#allocation5 + $0x308] sm:$0xff] }
 0x15b   :  { %458 = vmatpush.msra.mxu0 %v424_v5  ;;  %v677_v5 = vld [vmem:[#allocation8 + $0x368] sm:$0xff] }
 0x15d   :  { %459 = vmatpush.msra.mxu0 %v423_v6  ;;  %v676_v6 = vld [vmem:[#allocation8 + $0x360] sm:$0xff] }
 0x15f   :  { %622 = vmatpush.msrb.mxu0 %v542_v7  ;;  %v675_v7 = vld [vmem:[#allocation8 + $0x358] sm:$0xff] }
 0x161   :  { %623 = vmatpush.msrb.mxu0 %v540_v8  ;;  %v674_v8 = vld [vmem:[#allocation8 + $0x350] sm:$0xff] }
 0x163   :  { %624 = vmatpush.msrb.mxu0 %v538_v9  ;;  %v673_v9 = vld [vmem:[#allocation8 + $0x348] sm:$0xff] }
 0x165   :  { %625 = vmatpush.msrb.mxu0 %v536_v10  ;;  %v672_v10 = vld [vmem:[#allocation8 + $0x340] sm:$0xff] }
 0x167   :  { %626 = vmatpush.msrb.mxu0 %v534_v11  ;;  %v1115_v11 = vld [vmem:[#allocation10 + $0x4] ss:$0 sm:$0xff] }
 0x169   :  { %627 = vmatpush.msrb.mxu0 %v532_v12  ;;  %v671_v12 = vld [vmem:[#allocation8 + $0x338] sm:$0xff] }
 0x16b   :  { %628 = vmatpush.msrb.mxu0 %v530_v13 }
 0x16d   :  { %629 = vmatpush.msrb.mxu0 %v528_v14  ;;  %v670_v14 = vld [vmem:[#allocation8 + $0x330] sm:$0xff] }
 0x16f   :  { %630 = vmatpush.msrb.mxu0 %v526_v16  ;;  %v166_v16 = vperm.slane %v1346_v61, 1  ;;  %v666_v61 = vld [vmem:[#allocation8 + $0x310] sm:$0xff] }
 0x171   :  { %631 = vmatpush.msrb.mxu0 %v524_v18  ;;  %v227_v18 = vadd.f32 %v1359_v32, %v166_v16  ;;  %v664_v32 = vld [vmem:[#allocation8 + $0x300] sm:$0xff] }
 0x172   :  { %v946_v16 = vld [vmem:[#allocation5 + $0x4a0] sm:$0xff] }
 0x173   :  { %632 = vmatpush.msrb.mxu0 %v522_v20  ;;  %v247_v21 = vadd.f32 %v1361_v42, %v227_v18  ;;  %v713_v42 = vld [vmem:[#allocation8 + $0x3b0] sm:$0xff]  ;;  %v942_v18 = vld [vmem:[#allocation5 + $0x480] sm:$0xff] }
 0x175   :  { %633 = vmatpush.msrb.mxu0 %v520_v22 }
 0x1bb   :  { %v330_v26 = vpop.f32.mrf.mxu1 }
 0x1bc   :  { %v331_v27 = vadd.f32 %v1112_v23, %v330_v26  ;;  %v518_v23 = vld [vmem:[#allocation5 + $0x238] sm:$0xff]  ;;  %v512_v26 = vld [vmem:[#allocation5 + $0x208] sm:$0xff] }
 0x1bd   :  { %634 = vmatpush.msrb.mxu0 %v518_v23 }
 0x1be   :  { %v1355_v29 = vadd.f32 %v331_v27, %v1349_v4  ;;  %v573_v27 = vld [vmem:[#allocation5 + $0x3f0] sm:$0xff] }
 0x1bf   :  { %635 = vmatpush.msrb.mxu0 %v516_v24  ;;  %602 = vmatpush.msra.mxu3 %v573_v27  ;;  %v668_v27 = vld [vmem:[#allocation8 + $0x320] sm:$0xff] }
 0x1c0   :  { %v334_v31 = vmax.f32 %v1355_v29, 0.0 }
 0x1c1   :  { %636 = vmatpush.msrb.mxu0 %v514_v25  ;;  %603 = vmatpush.msra.mxu3 %v571_v30  ;;  %v665_v30 = vld [vmem:[#allocation8 + $0x308] sm:$0xff] }
 0x1c2   :  { %373 = vmatmul.f32.vlgmr.msrb.gmra.mxu2 %v334_v31  ;;  %v572_v31 = vld [vmem:[#allocation5 + $0x3e8] sm:$0xff] }
 0x1c3   :  { %637 = vmatpush.msrb.mxu0 %v512_v26  ;;  %643 = vmatpush.msrb.mxu1 %v572_v31  ;;  %v669_v26 = vld [vmem:[#allocation8 + $0x328] sm:$0xff]  ;;  %v722_v31 = vld [vmem:[#allocation8 + $0x3f8] sm:$0xff] }
 0x1c4   :  { %604 = vmatpush.msra.mxu3 %v569_v34  ;;  %685 = vmatpush.msrb.mxu2 %v679_v33  ;;  %v721_v34 = vld [vmem:[#allocation8 + $0x3f0] sm:$0xff]  ;;  %v754_v33 = vld [vmem:[#allocation8 + $0x418] sm:$0xff] }
 0x1c5   :  { %644 = vmatpush.msrb.mxu1 %v570_v35  ;;  %v720_v35 = vld [vmem:[#allocation8 + $0x3e8] sm:$0xff] }
 0x1c6   :  { %605 = vmatpush.msra.mxu3 %v567_v36  ;;  %v719_v36 = vld [vmem:[#allocation8 + $0x3e0] sm:$0xff] }
 0x1c7   :  { %645 = vmatpush.msrb.mxu1 %v568_v37  ;;  %v718_v37 = vld [vmem:[#allocation8 + $0x3d8] sm:$0xff] }
 0x1c8   :  { %606 = vmatpush.msra.mxu3 %v565_v38  ;;  %v717_v38 = vld [vmem:[#allocation8 + $0x3d0] sm:$0xff] }
 0x1c9   :  { %646 = vmatpush.msrb.mxu1 %v566_v39  ;;  %v716_v39 = vld [vmem:[#allocation8 + $0x3c8] sm:$0xff] }
 0x1ca   :  { %598 = vmatmul.f32.vlgmr.msra.gmra.mxu2 %v1349_v4  ;;  %607 = vmatpush.msra.mxu3 %v563_v40  ;;  %v715_v40 = vld [vmem:[#allocation8 + $0x3c0] sm:$0xff] }
 0x1cb   :  { %647 = vmatpush.msrb.mxu1 %v564_v41  ;;  %v714_v41 = vld [vmem:[#allocation8 + $0x3b8] sm:$0xff] }
 0x1cc   :  { %608 = vmatpush.msra.mxu3 %v561_v43  ;;  %v712_v43 = vld [vmem:[#allocation8 + $0x3a8] sm:$0xff] }
 0x1cd   :  { %648 = vmatpush.msrb.mxu1 %v562_v44  ;;  %v1368_v44 = vld [vmem:[#allocation7 + $0x2] sm:$0x3] }
 0x1ce   :  { %609 = vmatpush.msra.mxu3 %v559_v45  ;;  %v711_v45 = vld [vmem:[#allocation8 + $0x3a0] sm:$0xff] }
 0x1cf   :  { %649 = vmatpush.msrb.mxu1 %v560_v46  ;;  %v578_v46 = vperm.slane %v1368_v44, 0 }
 0x1d0   :  { %610 = vmatpush.msra.mxu3 %v557_v52 }
 0x1d1   :  { %650 = vmatpush.msrb.mxu1 %v558_v53  ;;  %v709_v53 = vld [vmem:[#allocation8 + $0x390] sm:$0xff] }
 0x1d2   :  { %611 = vmatpush.msra.mxu3 %v555_v54  ;;  %v708_v54 = vld [vmem:[#allocation8 + $0x388] sm:$0xff] }
 0x1d3   :  { %651 = vmatpush.msrb.mxu1 %v556_v55  ;;  %v707_v55 = vld [vmem:[#allocation8 + $0x380] sm:$0xff] }
 0x1d4   :  { %612 = vmatpush.msra.mxu3 %v553_v56  ;;  %v766_v56 = vld [vmem:[#allocation8 + $0x478] sm:$0xff] }
 0x1d5   :  { %652 = vmatpush.msrb.mxu1 %v554_v57  ;;  %v765_v57 = vld [vmem:[#allocation8 + $0x470] sm:$0xff] }
 0x1d7   :  { %653 = vmatpush.msrb.mxu1 %v552_v59  ;;  %v763_v59 = vld [vmem:[#allocation8 + $0x460] sm:$0xff] }
 0x1d9   :  { %654 = vmatpush.msrb.mxu1 %v550_v60  ;;  %v761_v60 = vld [vmem:[#allocation8 + $0x450] sm:$0xff] }
 0x1db   :  { %655 = vmatpush.msrb.mxu1 %v548_v62  ;;  %v759_v62 = vld [vmem:[#allocation8 + $0x440] sm:$0xff] }
 0x245   :  { %v374_v0 = vpop.f32.mrf.mxu2 }
 0x246   :  { %v375_v1 = vadd.f32 %v1113_v58, %v374_v0  ;;  %v551_v58 = vld [vmem:[#allocation5 + $0x340] sm:$0xff]  ;;  %v546_v0 = vld [vmem:[#allocation5 + $0x318] sm:$0xff] }
 0x247   :  { %613 = vmatpush.msra.mxu3 %v551_v58  ;;  %656 = vmatpush.msrb.mxu1 %v546_v0  ;;  %v764_v58 = vld [vmem:[#allocation8 + $0x468] sm:$0xff]  ;;  %v757_v0 = vld [vmem:[#allocation8 + $0x430] sm:$0xff] }
 0x248   :  { %v377_v3 = vmax.f32 %v375_v1, 0.0  ;;  %v543_v1 = vld [vmem:[#allocation5 + $0x300] sm:$0xff] }
 0x249   :  { %657 = vmatpush.msrb.mxu1 %v544_v2  ;;  %v755_v2 = vld [vmem:[#allocation8 + $0x420] sm:$0xff] }
 0x24a   :  { %416 = vmatmul.f32.vlgmr.msrb.gmra.mxu3 %v377_v3  ;;  %v678_v3 = vld [vmem:[#allocation8 + $0x370] sm:$0xff] }
 0x24b   :  { %686 = vmatpush.msrb.mxu2 %v678_v3  ;;  %v1117_v3 = vld [vmem:[#allocation10 + $0x6] ss:$0 sm:$0xff] }
 0x24d   :  { %687 = vmatpush.msrb.mxu2 %v677_v5  ;;  %v753_v5 = vld [vmem:[#allocation8 + $0x410] sm:$0xff] }
 0x24f   :  { %688 = vmatpush.msrb.mxu2 %v676_v6  ;;  %v752_v6 = vld [vmem:[#allocation8 + $0x408] sm:$0xff] }
 0x251   :  { %689 = vmatpush.msrb.mxu2 %v675_v7 }
 0x253   :  { %690 = vmatpush.msrb.mxu2 %v674_v8 }
 0x255   :  { %691 = vmatpush.msrb.mxu2 %v673_v9  ;;  %v751_v9 = vld [vmem:[#allocation8 + $0x400] sm:$0xff] }
 0x257   :  { %692 = vmatpush.msrb.mxu2 %v672_v10  ;;  %v956_v10 = vld [vmem:[#allocation5 + $0x4f0] sm:$0xff] }
 0x259   :  { %693 = vmatpush.msrb.mxu2 %v671_v12  ;;  %v954_v12 = vld [vmem:[#allocation5 + $0x4e0] sm:$0xff] }
 0x25b   :  { %694 = vmatpush.msrb.mxu2 %v670_v14  ;;  %v950_v14 = vld [vmem:[#allocation5 + $0x4c0] sm:$0xff] }
 0x25d   :  { %695 = vmatpush.msrb.mxu2 %v669_v26  ;;  %v926_v26 = vld [vmem:[#allocation5 + $0x400] sm:$0xff] }
 0x25f   :  { %696 = vmatpush.msrb.mxu2 %v668_v27  ;;  %v809_v27 = vld [vmem:[#allocation8 + $0x4f8] sm:$0xff] }
 0x261   :  { %697 = vmatpush.msrb.mxu2 %v667_v28  ;;  %v808_v28 = vld [vmem:[#allocation8 + $0x4f0] sm:$0xff] }
 0x263   :  { %698 = vmatpush.msrb.mxu2 %v666_v61  ;;  %v807_v61 = vld [vmem:[#allocation8 + $0x4e8] sm:$0xff] }
 0x265   :  { %699 = vmatpush.msrb.mxu2 %v665_v30  ;;  %v806_v30 = vld [vmem:[#allocation8 + $0x4e0] sm:$0xff] }
 0x267   :  { %700 = vmatpush.msrb.mxu2 %v664_v32  ;;  %v805_v32 = vld [vmem:[#allocation8 + $0x4d8] sm:$0xff] }
 0x2cd   :  { %v417_v48 = vpop.f32.mrf.mxu3 }
 0x2ce   :  { %v418_v49 = vadd.f32 %v1114_v47, %v417_v48  ;;  %v710_v47 = vld [vmem:[#allocation8 + $0x398] sm:$0xff]  ;;  %v599_v48 = vpop.f32.mrf.mxu2 }
 0x2d0   :  { %v420_v50 = vadd.f32 %v418_v49, %v1355_v29  ;;  %v549_v29 = vld [vmem:[#allocation5 + $0x330] sm:$0xff]  ;;  %v600_v49 = vadd.f32 %v599_v48, %v578_v46  ;;  %v797_v46 = vld [vmem:[#allocation8 + $0x498] sm:$0xff] }
 0x2d1   :  { %614 = vmatpush.msra.mxu3 %v549_v29  ;;  %v762_v29 = vld [vmem:[#allocation8 + $0x458] sm:$0xff]  ;;  %v795_v48 = vld [vmem:[#allocation8 + $0x488] sm:$0xff] }
 0x2d2   :  { %v421_v51 = vmax.f32 %v420_v50, 0.0 }
 0x2d4   :  { %460 = vmatmul.f32.vlgmr.msra.gmra.mxu0 %v421_v51  ;;  %502 = vmatmul.f32.vlgmr.msra.gmra.mxu1 %v421_v51 }
 0x2d5   :  { %772 = vmatpush.msra.mxu0 %v766_v56  ;;  %815 = vmatpush.msra.mxu1 %v809_v27  ;;  %v894_v56 = vld [vmem:[#allocation8 + $0x5f0] sm:$0xff]  ;;  %v883_v27 = vld [vmem:[#allocation8 + $0x598] sm:$0xff] }
 0x2d7   :  { %773 = vmatpush.msra.mxu0 %v765_v57  ;;  %816 = vmatpush.msra.mxu1 %v808_v28  ;;  %v849_v57 = vld [vmem:[#allocation8 + $0x558] sm:$0xff] }
 0x2d8   :  { %v941_v28 = vld [vmem:[#allocation5 + $0x478] sm:$0xff] }
 0x2d9   :  { %774 = vmatpush.msra.mxu0 %v764_v58  ;;  %817 = vmatpush.msra.mxu1 %v807_v61  ;;  %v893_v58 = vld [vmem:[#allocation8 + $0x5e8] sm:$0xff]  ;;  %v882_v61 = vld [vmem:[#allocation8 + $0x590] sm:$0xff] }
 0x2db   :  { %775 = vmatpush.msra.mxu0 %v763_v59  ;;  %818 = vmatpush.msra.mxu1 %v806_v30  ;;  %v848_v59 = vld [vmem:[#allocation8 + $0x550] sm:$0xff]  ;;  %v939_v30 = vld [vmem:[#allocation5 + $0x468] sm:$0xff] }
 0x2dc   :  { %638 = vmatmul.f32.vlgmr.msrb.gmra.mxu0 %v1349_v4  ;;  %v547_v4 = vld [vmem:[#allocation5 + $0x320] sm:$0xff] }
 0x2dd   :  { %615 = vmatpush.msra.mxu3 %v547_v4  ;;  %776 = vmatpush.msra.mxu0 %v762_v29  ;;  %v760_v4 = vld [vmem:[#allocation8 + $0x448] sm:$0xff]  ;;  %v892_v29 = vld [vmem:[#allocation8 + $0x5e0] sm:$0xff] }
 0x2de   :  { %819 = vmatpush.msra.mxu1 %v805_v32  ;;  %v881_v32 = vld [vmem:[#allocation8 + $0x588] sm:$0xff] }
 0x2df   :  { %616 = vmatpush.msra.mxu3 %v545_v63  ;;  %777 = vmatpush.msra.mxu0 %v761_v60  ;;  %v758_v63 = vld [vmem:[#allocation8 + $0x438] sm:$0xff]  ;;  %v847_v60 = vld [vmem:[#allocation8 + $0x548] sm:$0xff] }
 0x2e1   :  { %617 = vmatpush.msra.mxu3 %v543_v1  ;;  %778 = vmatpush.msra.mxu0 %v760_v4  ;;  %v756_v1 = vld [vmem:[#allocation8 + $0x428] sm:$0xff]  ;;  %v891_v4 = vld [vmem:[#allocation8 + $0x5d8] sm:$0xff] }
 0x2e3   :  { %728 = vmatpush.msrb.mxu3 %v722_v31  ;;  %779 = vmatpush.msra.mxu0 %v759_v62  ;;  %v804_v31 = vld [vmem:[#allocation8 + $0x4d0] sm:$0xff]  ;;  %v846_v62 = vld [vmem:[#allocation8 + $0x540] sm:$0xff] }
 0x2e4   :  { %820 = vmatpush.msra.mxu1 %v804_v31  ;;  %v937_v31 = vld [vmem:[#allocation5 + $0x458] sm:$0xff] }
 0x2e5   :  { %729 = vmatpush.msrb.mxu3 %v721_v34  ;;  %780 = vmatpush.msra.mxu0 %v758_v63  ;;  %v803_v34 = vld [vmem:[#allocation8 + $0x4c8] sm:$0xff]  ;;  %v890_v63 = vld [vmem:[#allocation8 + $0x5d0] sm:$0xff] }
 0x2e6   :  { %821 = vmatpush.msra.mxu1 %v803_v34  ;;  %v880_v34 = vld [vmem:[#allocation8 + $0x580] sm:$0xff] }
 0x2e7   :  { %730 = vmatpush.msrb.mxu3 %v720_v35  ;;  %781 = vmatpush.msra.mxu0 %v757_v0  ;;  %v802_v35 = vld [vmem:[#allocation8 + $0x4c0] sm:$0xff]  ;;  %v845_v0 = vld [vmem:[#allocation8 + $0x538] sm:$0xff] }
 0x2e8   :  { %822 = vmatpush.msra.mxu1 %v802_v35  ;;  %v935_v35 = vld [vmem:[#allocation5 + $0x448] sm:$0xff] }
 0x2e9   :  { %731 = vmatpush.msrb.mxu3 %v719_v36  ;;  %782 = vmatpush.msra.mxu0 %v756_v1  ;;  %v1118_v36 = vld [vmem:[#allocation10 + $0x7] ss:$0 sm:$0xff]  ;;  %v889_v1 = vld [vmem:[#allocation8 + $0x5c8] sm:$0xff] }
 0x2eb   :  { %732 = vmatpush.msrb.mxu3 %v718_v37  ;;  %783 = vmatpush.msra.mxu0 %v755_v2  ;;  %v801_v37 = vld [vmem:[#allocation8 + $0x4b8] sm:$0xff] }
 0x2ec   :  { %823 = vmatpush.msra.mxu1 %v801_v37  ;;  %v931_v37 = vld [vmem:[#allocation5 + $0x428] sm:$0xff] }
 0x2ed   :  { %733 = vmatpush.msrb.mxu3 %v717_v38  ;;  %784 = vmatpush.msra.mxu0 %v754_v33  ;;  %v800_v38 = vld [vmem:[#allocation8 + $0x4b0] sm:$0xff] }
 0x2ee   :  { %824 = vmatpush.msra.mxu1 %v800_v38  ;;  %v844_v33 = vld [vmem:[#allocation8 + $0x530] sm:$0xff] }
 0x2ef   :  { %734 = vmatpush.msrb.mxu3 %v716_v39  ;;  %785 = vmatpush.msra.mxu0 %v753_v5  ;;  %v843_v5 = vld [vmem:[#allocation8 + $0x528] sm:$0xff]  ;;  %v929_v38 = vld [vmem:[#allocation5 + $0x418] sm:$0xff] }
 0x2f1   :  { %735 = vmatpush.msrb.mxu3 %v715_v40  ;;  %786 = vmatpush.msra.mxu0 %v752_v6  ;;  %v887_v6 = vld [vmem:[#allocation8 + $0x5b8] sm:$0xff] }
 0x2f3   :  { %736 = vmatpush.msrb.mxu3 %v714_v41  ;;  %787 = vmatpush.msra.mxu0 %v751_v9  ;;  %v799_v41 = vld [vmem:[#allocation8 + $0x4a8] sm:$0xff]  ;;  %v886_v9 = vld [vmem:[#allocation8 + $0x5b0] sm:$0xff] }
 0x2f4   :  { %825 = vmatpush.msra.mxu1 %v799_v41  ;;  %v989_v41 = vld [vmem:[#allocation5 + $0x5f8] sm:$0xff] }
 0x2f5   :  { %737 = vmatpush.msrb.mxu3 %v713_v42  ;;  %997 = vmatpush.msrb.mxu0 %v956_v10  ;;  %v841_v10 = vld [vmem:[#allocation8 + $0x518] sm:$0xff] }
 0x2f7   :  { %738 = vmatpush.msrb.mxu3 %v712_v43  ;;  %998 = vmatpush.msrb.mxu0 %v954_v12  ;;  %v798_v43 = vld [vmem:[#allocation8 + $0x4a0] sm:$0xff] }
 0x2f8   :  { %826 = vmatpush.msra.mxu1 %v798_v43  ;;  %v986_v43 = vld [vmem:[#allocation5 + $0x5e0] sm:$0xff] }
 0x2f9   :  { %739 = vmatpush.msrb.mxu3 %v711_v45 }
 0x2fa   :  { %827 = vmatpush.msra.mxu1 %v797_v46  ;;  %v984_v46 = vld [vmem:[#allocation5 + $0x5d0] sm:$0xff] }
 0x2fb   :  { %740 = vmatpush.msrb.mxu3 %v710_v47  ;;  %v796_v47 = vld [vmem:[#allocation8 + $0x490] sm:$0xff] }
 0x2fc   :  { %828 = vmatpush.msra.mxu1 %v796_v47  ;;  %v985_v47 = vld [vmem:[#allocation5 + $0x5d8] sm:$0xff] }
 0x2fd   :  { %741 = vmatpush.msrb.mxu3 %v709_v53  ;;  %v851_v53 = vld [vmem:[#allocation8 + $0x568] sm:$0xff] }
 0x2fe   :  { %829 = vmatpush.msra.mxu1 %v795_v48  ;;  %v982_v48 = vld [vmem:[#allocation5 + $0x5c0] sm:$0xff] }
 0x2ff   :  { %742 = vmatpush.msrb.mxu3 %v708_v54  ;;  %v850_v54 = vld [vmem:[#allocation8 + $0x560] sm:$0xff] }
 0x301   :  { %743 = vmatpush.msrb.mxu3 %v707_v55  ;;  %v895_v55 = vld [vmem:[#allocation8 + $0x5f8] sm:$0xff] }
 0x351   :  { %v461_v13 = vpop.f32.mrf.mxu0  ;;  %v503_v20 = vpop.f32.mrf.mxu1 }
 0x352   :  { %v462_v15 = vadd.f32 %v1115_v11, %v461_v13  ;;  %v504_v23 = vadd.f32 %v1116_v19, %v503_v20  ;;  %v952_v13 = vld [vmem:[#allocation5 + $0x4d0] sm:$0xff]  ;;  %v938_v20 = vld [vmem:[#allocation5 + $0x460] sm:$0xff] }
 0x353   :  { %999 = vmatpush.msrb.mxu0 %v952_v13  ;;  %v940_v19 = vld [vmem:[#allocation5 + $0x470] sm:$0xff] }
 0x354   :  { %v506_v17 = vmul.f32 1.442695, %v462_v15  ;;  %v948_v15 = vld [vmem:[#allocation5 + $0x4b0] sm:$0xff] }
 0x355   :  { %1000 = vmatpush.msrb.mxu0 %v950_v14  ;;  %v840_v14 = vld [vmem:[#allocation8 + $0x510] sm:$0xff] }
 0x356   :  { %1123 = vpow2.f32 %v506_v17  ;;  %v944_v17 = vld [vmem:[#allocation5 + $0x490] sm:$0xff] }
 0x357   :  { %1001 = vmatpush.msrb.mxu0 %v948_v15  ;;  %v884_v15 = vld [vmem:[#allocation8 + $0x5a0] sm:$0xff] }
 0x359   :  { %1002 = vmatpush.msrb.mxu0 %v946_v16  ;;  %v1379_v2 = vpop.f32.mrf.mxu0 }
 0x35b   :  { %1003 = vmatpush.msrb.mxu0 %v944_v17  ;;  %v839_v17 = vld [vmem:[#allocation8 + $0x508] sm:$0xff] }
 0x35c   :  { %v1124_v22 = vpop.eup %1123 }
 0x35d   :  { %v508_v24 = vmul.f32 %v1124_v22, %v247_v21  ;;  %1004 = vmatpush.msrb.mxu0 %v942_v18  ;;  %v936_v21 = vld [vmem:[#allocation5 + $0x450] sm:$0xff]  ;;  %v934_v22 = vld [vmem:[#allocation5 + $0x440] sm:$0xff] }
 0x35e   :  { %v838_v18 = vld [vmem:[#allocation8 + $0x500] sm:$0xff] }
 0x35f   :  { %v509_v25 = vadd.f32 %v508_v24, %v504_v23  ;;  %1005 = vmatpush.msrb.mxu0 %v940_v19  ;;  %v932_v23 = vld [vmem:[#allocation5 + $0x430] sm:$0xff]  ;;  %v930_v24 = vld [vmem:[#allocation5 + $0x420] sm:$0xff]  ;;  %v957_v19 = vld [vmem:[#allocation5 + $0x4f8] sm:$0xff] }
 0x361   :  { %618 = vmatmul.f32.vlgmr.msra.gmra.mxu3 %v509_v25  ;;  %658 = vmatmul.f32.vlgmr.msrb.gmra.mxu1 %v509_v25  ;;  %v928_v25 = vld [vmem:[#allocation5 + $0x410] sm:$0xff] }
 0x362   :  { %1006 = vmatpush.msrb.mxu0 %v938_v20  ;;  %901 = vmatpush.msra.mxu3 %v895_v55  ;;  %v955_v20 = vld [vmem:[#allocation5 + $0x4e8] sm:$0xff] }
 0x364   :  { %1007 = vmatpush.msrb.mxu0 %v936_v21  ;;  %902 = vmatpush.msra.mxu3 %v894_v56  ;;  %v953_v21 = vld [vmem:[#allocation5 + $0x4d8] sm:$0xff]  ;;  %v976_v56 = vld [vmem:[#allocation5 + $0x590] sm:$0xff] }
 0x366   :  { %1008 = vmatpush.msrb.mxu0 %v934_v22  ;;  %903 = vmatpush.msra.mxu3 %v893_v58  ;;  %v951_v22 = vld [vmem:[#allocation5 + $0x4c8] sm:$0xff]  ;;  %v974_v58 = vld [vmem:[#allocation5 + $0x580] sm:$0xff] }
 0x368   :  { %1009 = vmatpush.msrb.mxu0 %v932_v23  ;;  %904 = vmatpush.msra.mxu3 %v892_v29  ;;  %v949_v23 = vld [vmem:[#allocation5 + $0x4b8] sm:$0xff]  ;;  %v1120_v29 = vld [vmem:[#allocation10 + $0x9] ss:$0 sm:$0xff] }
 0x36a   :  { %1010 = vmatpush.msrb.mxu0 %v930_v24  ;;  %905 = vmatpush.msra.mxu3 %v891_v4  ;;  %v947_v24 = vld [vmem:[#allocation5 + $0x4a8] sm:$0xff] }
 0x36c   :  { %1011 = vmatpush.msrb.mxu0 %v928_v25  ;;  %906 = vmatpush.msra.mxu3 %v890_v63  ;;  %v945_v25 = vld [vmem:[#allocation5 + $0x498] sm:$0xff] }
 0x36e   :  { %1012 = vmatpush.msrb.mxu0 %v926_v26  ;;  %907 = vmatpush.msra.mxu3 %v889_v1  ;;  %v943_v26 = vld [vmem:[#allocation5 + $0x488] sm:$0xff]  ;;  %v973_v1 = vld [vmem:[#allocation5 + $0x578] sm:$0xff] }
 0x3de   :  { %v659_v55 = vpop.f32.mrf.mxu1 }
 0x3e4   :  { %v619_v50 = vpop.f32.mrf.mxu3 }
 0x3e5   :  { %v1371_v51 = vadd.f32 %v619_v50, %v600_v49  ;;  %v794_v49 = vld [vmem:[#allocation8 + $0x480] sm:$0xff]  ;;  %v853_v50 = vld [vmem:[#allocation8 + $0x578] sm:$0xff] }
 0x3e6   :  { %830 = vmatpush.msra.mxu1 %v794_v49  ;;  %859 = vmatpush.msra.mxu2 %v853_v50  ;;  %v983_v49 = vld [vmem:[#allocation5 + $0x5c8] sm:$0xff]  ;;  %v980_v50 = vld [vmem:[#allocation5 + $0x5b0] sm:$0xff] }
 0x3e7   :  { %v662_v52 = vmax.f32 %v1371_v51, 0.0 }
 0x3e9   :  { %701 = vmatmul.f32.vlgmr.msrb.gmra.mxu2 %v662_v52  ;;  %v852_v52 = vld [vmem:[#allocation8 + $0x570] sm:$0xff] }
 0x3ea   :  { %860 = vmatpush.msra.mxu2 %v852_v52  ;;  %v981_v52 = vld [vmem:[#allocation5 + $0x5b8] sm:$0xff] }
 0x3ec   :  { %861 = vmatpush.msra.mxu2 %v851_v53  ;;  %v978_v53 = vld [vmem:[#allocation5 + $0x5a0] sm:$0xff] }
 0x3ee   :  { %862 = vmatpush.msra.mxu2 %v850_v54  ;;  %v979_v54 = vld [vmem:[#allocation5 + $0x5a8] sm:$0xff] }
 0x3f0   :  { %863 = vmatpush.msra.mxu2 %v849_v57  ;;  %v977_v57 = vld [vmem:[#allocation5 + $0x598] sm:$0xff] }
 0x3f2   :  { %864 = vmatpush.msra.mxu2 %v848_v59  ;;  %v975_v59 = vld [vmem:[#allocation5 + $0x588] sm:$0xff] }
 0x3f4   :  { %865 = vmatpush.msra.mxu2 %v847_v60 }
 0x3f6   :  { %866 = vmatpush.msra.mxu2 %v846_v62 }
 0x3f8   :  { %867 = vmatpush.msra.mxu2 %v845_v0  ;;  %v972_v0 = vld [vmem:[#allocation5 + $0x570] sm:$0xff] }
 0x3fa   :  { %868 = vmatpush.msra.mxu2 %v844_v33  ;;  %v970_v33 = vld [vmem:[#allocation5 + $0x560] sm:$0xff] }
 0x3fc   :  { %869 = vmatpush.msra.mxu2 %v843_v5  ;;  %v968_v5 = vld [vmem:[#allocation5 + $0x550] sm:$0xff] }
 0x46c   :  { %v702_v7 = vpop.f32.mrf.mxu2 }
 0x46d   :  { %v703_v8 = vadd.f32 %v1117_v3, %v702_v7  ;;  %v888_v3 = vld [vmem:[#allocation8 + $0x5c0] sm:$0xff]  ;;  %v1119_v7 = vld [vmem:[#allocation10 + $0x8] ss:$0 sm:$0xff] }
 0x46e   :  { %908 = vmatpush.msra.mxu3 %v888_v3  ;;  %v971_v3 = vld [vmem:[#allocation5 + $0x568] sm:$0xff] }
 0x46f   :  { %v705_v11 = vmax.f32 %v703_v8, 0.0  ;;  %v842_v8 = vld [vmem:[#allocation8 + $0x520] sm:$0xff] }
 0x470   :  { %909 = vmatpush.msra.mxu3 %v887_v6  ;;  %870 = vmatpush.msra.mxu2 %v842_v8  ;;  %v969_v6 = vld [vmem:[#allocation5 + $0x558] sm:$0xff]  ;;  %v967_v8 = vld [vmem:[#allocation5 + $0x548] sm:$0xff] }
 0x471   :  { %744 = vmatmul.f32.vlgmr.msrb.gmra.mxu3 %v705_v11  ;;  %v885_v11 = vld [vmem:[#allocation8 + $0x5a8] sm:$0xff] }
 0x472   :  { %910 = vmatpush.msra.mxu3 %v886_v9  ;;  %871 = vmatpush.msra.mxu2 %v841_v10  ;;  %v965_v9 = vld [vmem:[#allocation5 + $0x538] sm:$0xff]  ;;  %v963_v10 = vld [vmem:[#allocation5 + $0x528] sm:$0xff] }
 0x474   :  { %911 = vmatpush.msra.mxu3 %v885_v11  ;;  %872 = vmatpush.msra.mxu2 %v840_v14  ;;  %v960_v11 = vld [vmem:[#allocation5 + $0x510] sm:$0xff]  ;;  %v959_v14 = vld [vmem:[#allocation5 + $0x508] sm:$0xff] }
 0x476   :  { %912 = vmatpush.msra.mxu3 %v884_v15  ;;  %873 = vmatpush.msra.mxu2 %v839_v17  ;;  %v1121_v15 = vld [vmem:[#allocation10 + $0xa] ss:$0 sm:$0xff] }
 0x478   :  { %874 = vmatpush.msra.mxu2 %v838_v18  ;;  %913 = vmatpush.msra.mxu3 %v883_v27 }
 0x47a   :  { %1037 = vmatpush.msrb.mxu2 %v957_v19  ;;  %914 = vmatpush.msra.mxu3 %v882_v61  ;;  %v579_v19 = vperm.slane %v1368_v44, 1 }
 0x47c   :  { %1038 = vmatpush.msrb.mxu2 %v955_v20  ;;  %915 = vmatpush.msra.mxu3 %v881_v32  ;;  %v640_v20 = vadd.f32 %v1379_v2, %v579_v19 }
 0x47e   :  { %1039 = vmatpush.msrb.mxu2 %v953_v21  ;;  %916 = vmatpush.msra.mxu3 %v880_v34  ;;  %v1122_v21 = vld [vmem:[#allocation10 + $0xb] ss:$0 sm:$0xff] }
 0x480   :  { %1040 = vmatpush.msrb.mxu2 %v951_v22  ;;  %1057 = vmatpush.msrb.mxu3 %v989_v41 }
 0x482   :  { %1041 = vmatpush.msrb.mxu2 %v949_v23  ;;  %v660_v23 = vadd.f32 %v659_v55, %v640_v20 }
 0x484   :  { %1042 = vmatpush.msrb.mxu2 %v947_v24 }
 0x486   :  { %1043 = vmatpush.msrb.mxu2 %v945_v25 }
 0x488   :  { %1044 = vmatpush.msrb.mxu2 %v943_v26 }
 0x48a   :  { %1045 = vmatpush.msrb.mxu2 %v941_v28  ;;  %v991_v28 = vld [vmem:[#allocation7 + $0x4] sm:$0x3] }
 0x48b   :  { %v993_v61 = vperm.slane %v991_v28, 0  ;;  %v994_v34 = vperm.slane %v991_v28, 1 }
 0x48c   :  { %1046 = vmatpush.msrb.mxu2 %v939_v30 }
 0x48e   :  { %1047 = vmatpush.msrb.mxu2 %v937_v31 }
 0x490   :  { %1048 = vmatpush.msrb.mxu2 %v935_v35 }
 0x4f4   :  { %v745_v39 = vpop.f32.mrf.mxu3 }
 0x4f5   :  { %v746_v40 = vadd.f32 %v1118_v36, %v745_v39  ;;  %v933_v36 = vld [vmem:[#allocation5 + $0x438] sm:$0xff]  ;;  %v927_v39 = vld [vmem:[#allocation5 + $0x408] sm:$0xff] }
 0x4f6   :  { %1049 = vmatpush.msrb.mxu2 %v933_v36 }
 0x4f7   :  { %v1375_v42 = vadd.f32 %v746_v40, %v1371_v51  ;;  %v988_v40 = vld [vmem:[#allocation5 + $0x5f0] sm:$0xff] }
 0x4f8   :  { %1050 = vmatpush.msrb.mxu2 %v931_v37  ;;  %1017 = vmatpush.msrb.mxu1 %v988_v40 }
 0x4f9   :  { %v749_v45 = vmax.f32 %v1375_v42, 0.0 }
 0x4fa   :  { %1051 = vmatpush.msrb.mxu2 %v929_v38  ;;  %1018 = vmatpush.msrb.mxu1 %v986_v43 }
 0x4fb   :  { %788 = vmatmul.f32.vlgmr.msra.gmra.mxu0 %v749_v45  ;;  %v987_v45 = vld [vmem:[#allocation5 + $0x5e8] sm:$0xff] }
 0x4fc   :  { %1052 = vmatpush.msrb.mxu2 %v927_v39  ;;  %1058 = vmatpush.msrb.mxu3 %v987_v45 }
 0x4fd   :  { %1019 = vmatpush.msrb.mxu1 %v984_v46 }
 0x4fe   :  { %1059 = vmatpush.msrb.mxu3 %v985_v47 }
 0x4ff   :  { %1020 = vmatpush.msrb.mxu1 %v982_v48 }
 0x500   :  { %1060 = vmatpush.msrb.mxu3 %v983_v49 }
 0x501   :  { %1021 = vmatpush.msrb.mxu1 %v980_v50 }
 0x502   :  { %1061 = vmatpush.msrb.mxu3 %v981_v52 }
 0x503   :  { %1013 = vmatmul.f32.vlgmr.msrb.gmra.mxu0 %v1371_v51  ;;  %1022 = vmatpush.msrb.mxu1 %v978_v53 }
 0x504   :  { %1062 = vmatpush.msrb.mxu3 %v979_v54 }
 0x505   :  { %1023 = vmatpush.msrb.mxu1 %v976_v56 }
 0x506   :  { %1063 = vmatpush.msrb.mxu3 %v977_v57 }
 0x507   :  { %1024 = vmatpush.msrb.mxu1 %v974_v58 }
 0x508   :  { %1064 = vmatpush.msrb.mxu3 %v975_v59 }
 0x509   :  { %1025 = vmatpush.msrb.mxu1 %v972_v0 }
 0x50a   :  { %1065 = vmatpush.msrb.mxu3 %v973_v1 }
 0x50b   :  { %1026 = vmatpush.msrb.mxu1 %v970_v33 }
 0x50c   :  { %1066 = vmatpush.msrb.mxu3 %v971_v3 }
 0x50d   :  { %1027 = vmatpush.msrb.mxu1 %v968_v5 }
 0x50e   :  { %1067 = vmatpush.msrb.mxu3 %v969_v6 }
 0x510   :  { %1068 = vmatpush.msrb.mxu3 %v967_v8 }
 0x512   :  { %1069 = vmatpush.msrb.mxu3 %v965_v9 }
 0x514   :  { %1070 = vmatpush.msrb.mxu3 %v963_v10 }
 0x578   :  { %v789_v12 = vpop.f32.mrf.mxu0 }
 0x579   :  { %v790_v13 = vadd.f32 %v1119_v7, %v789_v12  ;;  %v966_v7 = vld [vmem:[#allocation5 + $0x540] sm:$0xff]  ;;  %v961_v12 = vld [vmem:[#allocation5 + $0x518] sm:$0xff] }
 0x57a   :  { %1028 = vmatpush.msrb.mxu1 %v966_v7  ;;  %1071 = vmatpush.msrb.mxu3 %v961_v12 }
 0x57b   :  { %v792_v16 = vmax.f32 %v790_v13, 0.0  ;;  %v958_v13 = vld [vmem:[#allocation5 + $0x500] sm:$0xff] }
 0x57c   :  { %1072 = vmatpush.msrb.mxu3 %v959_v14 }
 0x57d   :  { %831 = vmatmul.f32.vlgmr.msra.gmra.mxu1 %v792_v16 }
 0x580   :  { %v1014_v30 = vpop.f32.mrf.mxu0 }
 0x581   :  { %v1015_v32 = vadd.f32 %v1014_v30, %v993_v61 }
 0x5fa   :  { %v832_v60 = vpop.f32.mrf.mxu1 }
 0x5fb   :  { %v833_v4 = vadd.f32 %v1120_v29, %v832_v60 }
 0x5fd   :  { %v835_v62 = vadd.f32 %v833_v4, %v1375_v42  ;;  %v964_v42 = vld [vmem:[#allocation5 + $0x530] sm:$0xff] }
 0x5fe   :  { %1029 = vmatpush.msrb.mxu1 %v964_v42 }
 0x5ff   :  { %v836_v63 = vmax.f32 %v835_v62, 0.0 }
 0x601   :  { %875 = vmatmul.f32.vlgmr.msra.gmra.mxu2 %v836_v63  ;;  %917 = vmatmul.f32.vlgmr.msra.gmra.mxu3 %v836_v63 }
 0x609   :  { %1053 = vmatmul.f32.vlgmr.msrb.gmra.mxu2 %v1371_v51  ;;  %v962_v51 = vld [vmem:[#allocation5 + $0x520] sm:$0xff] }
 0x60a   :  { %1030 = vmatpush.msrb.mxu1 %v962_v51 }
 0x60c   :  { %1031 = vmatpush.msrb.mxu1 %v960_v11 }
 0x60e   :  { %1032 = vmatpush.msrb.mxu1 %v958_v13 }
 0x684   :  { %v876_v16 = vpop.f32.mrf.mxu2  ;;  %v918_v22 = vpop.f32.mrf.mxu3 }
 0x685   :  { %v877_v17 = vadd.f32 %v1121_v15, %v876_v16  ;;  %v919_v25 = vadd.f32 %v1122_v21, %v918_v22 }
 0x687   :  { %v921_v18 = vmul.f32 1.442695, %v877_v17 }
 0x689   :  { %1125 = vpow2.f32 %v921_v18 }
 0x68c   :  { %v1054_v44 = vpop.f32.mrf.mxu2 }
 0x68d   :  { %v1055_v2 = vadd.f32 %v1054_v44, %v994_v34 }
 0x68f   :  { %v1126_v24 = vpop.eup %1125 }
 0x690   :  { %v923_v26 = vmul.f32 %v1126_v24, %v660_v23 }
 0x692   :  { %v924_v27 = vadd.f32 %v923_v26, %v919_v25 }
 0x694   :  { %1033 = vmatmul.f32.vlgmr.msrb.gmra.mxu1 %v924_v27  ;;  %1073 = vmatmul.f32.vlgmr.msrb.gmra.mxu3 %v924_v27 }
 0x711   :  { %v1034_v31 = vpop.f32.mrf.mxu1 }
 0x712   :  { %v1035_v35 = vadd.f32 %v1034_v31, %v1015_v32 }
 0x714   :  { %1077 = vst [vmem:[#allocation11] sm:$0xff] %v1035_v35 }
 0x717   :  { %v1074_v36 = vpop.f32.mrf.mxu3 }
 0x718   :  { %v1075_v37 = vadd.f32 %v1074_v36, %v1055_v2 }
 0x71a   :  { %1078 = vst [vmem:[#allocation11 + $0x8] sm:$0xff] %v1075_v37 }
 0x71b   :  { %1089 = dma.vmem_to_hbm [thread:$0]  %s1085_s4, 256, %s1087_s24, [#allocation4]  }
 0x71c   :  { %1277 = dma.done.wait [#allocation4], 256  }
 0x71d   :  { %1278 = vsyncadd [#allocation4], 4294967040 }
 0x71e   :  { %1094 = vsyncpa [#allocation3], 1 }
 0x71f   :  { %1095 = vsyncpa [#allocation6], 1 }
 0x720   :  { %1096 = vsyncpa [#allocation9], 1 }
 0x721   :  { %1097 = vsyncpa [#allocation4], 1 }

</bundles_post_ra>
